<compile_context>
chip_gen: v5e
topology: v5e:2x2
jax: 0.10.0
libtpu: 0.0.40
codegen_flags: <defaults>
</compile_context>

<pallas_src>
import jax
import jax.numpy as jnp
from jax.experimental import pallas as pl
from jax.experimental.pallas import tpu as pltpu

IN_FEATURES = 28 * 28      # 784
HIDDEN = 512
NUM_CLASSES = 10
PADDED_CLASSES = 128       # lane-dense output width (multiple of 128)
MAX_TM = 2048              # batch-tile cap; ~24 MiB footprint, fits v7x VMEM
VMEM_LIMIT_BYTES = 48 * 1024 * 1024   # <= 64 MiB physical on v7x, <= 128 elsewhere
MASK_VALUE = -1e30         # class-pad logit sentinel: exp(MASK - m) == 0 in f32

# Flips to False if this JAX build rejects pipeline_mode=pl.Buffered(...).
_PIPELINE_MODE_OK = True


def _round_up(a, m):
    return (a + m - 1) // m * m


def _pick_tile(batch, max_tm):
    """Batch tile: multiple of 16 (bf16 sublane packing), capped by max_tm, and
    split into >= 2 tiles when possible so the 'parallel' axis feeds both TCs on v7x."""
    rows = _round_up(batch, 16)
    if rows <= 16:
        return rows
    if rows >= 2 * max_tm:
        return max_tm
    half = _round_up((rows + 1) // 2, 16)
    return min(max_tm, half)


def _net_kernel(x_ref, w1_ref, b1_ref, w2_ref, b2_ref, o_ref):
    # fc1: bf16 x bf16 on the MXU, f32 accumulation.
    h = jnp.dot(x_ref[...], w1_ref[...], preferred_element_type=jnp.float32)
    # bias + ReLU in f32 (b1_ref is a resident (1,512) block)
    h = jnp.maximum(h + b1_ref[...], 0.0)

    # fc2: bf16 inputs, f32 acc, lane-dense 128-wide (zero-padded) logits.
    logits = jnp.dot(h.astype(jnp.bfloat16), w2_ref[...],
                     preferred_element_type=jnp.float32)
    # b2_ref carries MASK_VALUE in the 118 pad lanes, so they drop out of the
    # log-softmax normalizer with no per-tile iota/where needed.
    logits = logits + b2_ref[...]

    # numerically stable log_softmax over the class axis (dim=1)
    m = jnp.max(logits, axis=-1, keepdims=True)
    shifted = logits - m
    lse = jnp.log(jnp.sum(jnp.exp(shifted), axis=-1, keepdims=True))
    o_ref[...] = (shifted - lse).astype(o_ref.dtype)


def prepare_params(w1, b1, w2, b2):
    """One-time weight packing (hoist out of the per-call path):
    bf16 casts, lane-dense zero-pad of W2 (10 -> 128), bias reshape, and the
    class-padding mask folded into the fc2 bias."""
    w1_bf = w1.astype(jnp.bfloat16)
    b1_2d = b1.reshape(1, HIDDEN).astype(jnp.float32)
    w2_p = jnp.zeros((HIDDEN, PADDED_CLASSES), jnp.bfloat16)
    w2_p = w2_p.at[:, :NUM_CLASSES].set(w2.astype(jnp.bfloat16))
    b2_p = jnp.full((1, PADDED_CLASSES), MASK_VALUE, jnp.float32)
    b2_p = b2_p.at[:, :NUM_CLASSES].set(b2.reshape(1, NUM_CLASSES).astype(jnp.float32))
    return w1_bf, b1_2d, w2_p, b2_p


def _make_specs(tm, use_pipeline_mode):
    def spec(shape, index_map, buffers):
        if use_pipeline_mode:
            return pl.BlockSpec(shape, index_map, pipeline_mode=pl.Buffered(buffers))
        return pl.BlockSpec(shape, index_map)

    in_specs = [
        # streamed activation tiles: triple-buffered to hide DMA jitter
        spec((tm, IN_FEATURES), lambda i: (i, 0), 3),
        # weights / biases: constant index_map -> VMEM-resident, single buffer
        spec((IN_FEATURES, HIDDEN), lambda i: (0, 0), 1),
        spec((1, HIDDEN), lambda i: (0, 0), 1),
        spec((HIDDEN, PADDED_CLASSES), lambda i: (0, 0), 1),
        spec((1, PADDED_CLASSES), lambda i: (0, 0), 1),
    ]
    out_spec = pl.BlockSpec((tm, PADDED_CLASSES), lambda i: (i, 0))
    return in_specs, out_spec


def net_forward(x, w1, b1, w2, b2, *, max_tm=MAX_TM):
    """x: (B,1,28,28) or (B,784).  Weights either raw (w1:(784,512), b1:(512,),
    w2:(512,10), b2:(10,)) or already packed by prepare_params.
    Returns (B, 10) float32 log-probs == F.log_softmax(fc2(relu(fc1(x))), dim=1)."""
    global _PIPELINE_MODE_OK

    if w2.shape[-1] != PADDED_CLASSES:          # raw params -> pack on the fly
        w1, b1, w2, b2 = prepare_params(w1, b1, w2, b2)
    w1_bf, b1_2d, w2_p, b2_p = w1, b1, w2, b2

    x = x.reshape(-1, IN_FEATURES)              # == x.view(-1, 784)
    B = x.shape[0]

    TM = _pick_tile(B, max_tm)
    Bp = _round_up(B, TM)
    if Bp != B:
        x = jnp.pad(x, ((0, Bp - B), (0, 0)))   # pad rows; sliced off below
    x_bf = x.astype(jnp.bfloat16)

    def run(use_pipeline_mode):
        in_specs, out_spec = _make_specs(TM, use_pipeline_mode)
        return pl.pallas_call(
            _net_kernel,
            out_shape=jax.ShapeDtypeStruct((Bp, PADDED_CLASSES), jnp.float32),
            grid_spec=pltpu.PrefetchScalarGridSpec(
                num_scalar_prefetch=0,
                grid=(Bp // TM,),
                in_specs=in_specs,
                out_specs=out_spec,
            ),
            compiler_params=pltpu.CompilerParams(
                dimension_semantics=("parallel",),   # shard batch tiles across TCs (v7x)
                vmem_limit_bytes=VMEM_LIMIT_BYTES,
            ),
        )(x_bf, w1_bf, b1_2d, w2_p, b2_p)

    if _PIPELINE_MODE_OK:
        try:
            out = run(True)
        except Exception:
            # This JAX build doesn't support pipeline_mode / Buffered on TPU
            # pallas_call; fall back to default depth-2 pipelining.
            _PIPELINE_MODE_OK = False
            out = run(False)
    else:
        out = run(False)

    return out[:B, :NUM_CLASSES]


def net_forward_ref(x, w1, b1, w2, b2):
    """Pure-JAX f32 reference for validation."""
    x = x.reshape(-1, IN_FEATURES).astype(jnp.float32)
    h = jnp.maximum(x @ w1 + b1, 0.0)
    logits = h @ w2 + b2
    return jax.nn.log_softmax(logits, axis=-1)


def init_params(key):
    """Deterministic parameter init matching nn.Linear shapes.
    Stored as (in_features, out_features) — transposed vs torch's weight."""
    k1, k2, k3, k4 = jax.random.split(key, 4)
    lim1 = 1.0 / jnp.sqrt(784.0)   # torch default: U(-1/sqrt(fan_in), 1/sqrt(fan_in))
    lim2 = 1.0 / jnp.sqrt(512.0)
    w1 = jax.random.uniform(k1, (IN_FEATURES, HIDDEN), jnp.float32, -lim1, lim1)
    b1 = jax.random.uniform(k2, (HIDDEN,), jnp.float32, -lim1, lim1)
    w2 = jax.random.uniform(k3, (HIDDEN, NUM_CLASSES), jnp.float32, -lim2, lim2)
    b2 = jax.random.uniform(k4, (NUM_CLASSES,), jnp.float32, -lim2, lim2)
    return w1, b1, w2, b2


if __name__ == "__main__":
    key = jax.random.PRNGKey(0)
    kx, kp, kx2 = jax.random.split(key, 3)

    w1, b1, w2, b2 = init_params(kp)
    params = prepare_params(w1, b1, w2, b2)   # hoisted one-time weight prep

    # small MNIST-like NCHW batch (single tile)
    B = 8
    x = jax.random.normal(kx, (B, 1, 28, 28), jnp.float32)
    out = jax.block_until_ready(net_forward(x, *params))
    assert out.shape == (B, NUM_CLASSES)
    row_sums = jnp.exp(out).sum(axis=1)
    assert jnp.allclose(row_sums, jnp.ones_like(row_sums), atol=1e-3)
    ref = net_forward_ref(x, w1, b1, w2, b2)
    assert float(jnp.max(jnp.abs(out - ref))) < 5e-2   # bf16-matmul tolerance

    # raw (unprepared) params must give the same result as prepared ones
    out_raw = jax.block_until_ready(net_forward(x, w1, b1, w2, b2))
    assert float(jnp.max(jnp.abs(out - out_raw))) == 0.0

    # non-tile-aligned batch with a tiny tile cap -> padding + multi-tile
    # "parallel" grid (3 tiles of 16 rows)
    B2 = 40
    x2 = jax.random.normal(kx2, (B2, 1, 28, 28), jnp.float32)
    out2 = jax.block_until_ready(net_forward(x2, *params, max_tm=16))
    assert out2.shape == (B2, NUM_CLASSES)
    ref2 = net_forward_ref(x2, w1, b1, w2, b2)
    assert float(jnp.max(jnp.abs(out2 - ref2))) < 5e-2

    # default tile cap on the same batch -> grid splits into 2 tiles (megacore)
    out3 = jax.block_until_ready(net_forward(x2, *params))
    assert float(jnp.max(jnp.abs(out3 - ref2))) < 5e-2

    print("KERNEL_OK")
</pallas_src>

<mosaic_0001>
module attributes {stable_mosaic.version = 11 : i64} {
  func.func @_net_kernel(%arg0: i32, %arg1: memref<16x784xbf16, #tpu.memory_space<vmem>>, %arg2: memref<784x512xbf16, #tpu.memory_space<vmem>>, %arg3: memref<1x512xf32, #tpu.memory_space<vmem>>, %arg4: memref<512x128xbf16, #tpu.memory_space<vmem>>, %arg5: memref<1x128xf32, #tpu.memory_space<vmem>>, %arg6: memref<16x128xf32, #tpu.memory_space<vmem>>) attributes {dimension_semantics = [#tpu.dimension_semantics<parallel>], iteration_bounds = array<i64: 1>, scalar_prefetch = 0 : i64, scratch_operands = 0 : i64, tpu.core_type = #tpu.core_type<tc>, window_params = [{transform_indices = @transform_0, window_bounds = array<i64: 16, 784>}, {pipeline_mode = #tpu.pipeline_mode<synchronous>, transform_indices = @transform_1, window_bounds = array<i64: 784, 512>}, {pipeline_mode = #tpu.pipeline_mode<synchronous>, transform_indices = @transform_2, window_bounds = array<i64: 1, 512>}, {pipeline_mode = #tpu.pipeline_mode<synchronous>, transform_indices = @transform_3, window_bounds = array<i64: 512, 128>}, {pipeline_mode = #tpu.pipeline_mode<synchronous>, transform_indices = @transform_4, window_bounds = array<i64: 1, 128>}, {transform_indices = @transform_5, window_bounds = array<i64: 16, 128>}]} {
    %c0 = arith.constant 0 : index
    %c0_0 = arith.constant 0 : index
    %0 = vector.load %arg1[%c0, %c0_0] : memref<16x784xbf16, #tpu.memory_space<vmem>>, vector<16x784xbf16>
    %c0_1 = arith.constant 0 : index
    %c0_2 = arith.constant 0 : index
    %1 = vector.load %arg2[%c0_1, %c0_2] : memref<784x512xbf16, #tpu.memory_space<vmem>>, vector<784x512xbf16>
    %cst = arith.constant dense<0.000000e+00> : vector<16x512xf32>
    %2 = tpu.matmul %0, %1, %cst {dimension_numbers = #tpu.dot_dimension_numbers<[1], [0], [0], [1], [0, 0, 1, 1], [], []>} : vector<16x784xbf16>, vector<784x512xbf16>, vector<16x512xf32> -> vector<16x512xf32>
    %c0_3 = arith.constant 0 : index
    %c0_4 = arith.constant 0 : index
    %3 = vector.load %arg3[%c0_3, %c0_4] : memref<1x512xf32, #tpu.memory_space<vmem>>, vector<1x512xf32>
    %4 = vector.broadcast %3 : vector<1x512xf32> to vector<16x512xf32>
    %5 = arith.addf %2, %4 : vector<16x512xf32>
    %cst_5 = arith.constant 0.000000e+00 : f32
    %6 = vector.broadcast %cst_5 : f32 to vector<16x512xf32>
    %7 = arith.maximumf %5, %6 : vector<16x512xf32>
    %8 = arith.truncf %7 : vector<16x512xf32> to vector<16x512xbf16>
    %c0_6 = arith.constant 0 : index
    %c0_7 = arith.constant 0 : index
    %9 = vector.load %arg4[%c0_6, %c0_7] : memref<512x128xbf16, #tpu.memory_space<vmem>>, vector<512x128xbf16>
    %cst_8 = arith.constant dense<0.000000e+00> : vector<16x128xf32>
    %10 = tpu.matmul %8, %9, %cst_8 {dimension_numbers = #tpu.dot_dimension_numbers<[1], [0], [0], [1], [0, 0, 1, 1], [], []>} : vector<16x512xbf16>, vector<512x128xbf16>, vector<16x128xf32> -> vector<16x128xf32>
    %c0_9 = arith.constant 0 : index
    %c0_10 = arith.constant 0 : index
    %11 = vector.load %arg5[%c0_9, %c0_10] : memref<1x128xf32, #tpu.memory_space<vmem>>, vector<1x128xf32>
    %12 = vector.broadcast %11 : vector<1x128xf32> to vector<16x128xf32>
    %13 = arith.addf %10, %12 : vector<16x128xf32>
    %cst_11 = arith.constant dense<0xFF800000> : vector<16xf32>
    %14 = vector.multi_reduction <maximumf>, %13, %cst_11 [1] : vector<16x128xf32> to vector<16xf32>
    %15 = vector.shape_cast %14 : vector<16xf32> to vector<16x1xf32>
    %16 = vector.broadcast %15 : vector<16x1xf32> to vector<16x128xf32>
    %17 = arith.subf %13, %16 : vector<16x128xf32>
    %18 = math.exp %17 : vector<16x128xf32>
    %cst_12 = arith.constant dense<0.000000e+00> : vector<16xf32>
    %19 = vector.multi_reduction <add>, %18, %cst_12 [1] : vector<16x128xf32> to vector<16xf32>
    %20 = vector.shape_cast %19 : vector<16xf32> to vector<16x1xf32>
    %21 = math.log %20 : vector<16x1xf32>
    %22 = vector.broadcast %21 : vector<16x1xf32> to vector<16x128xf32>
    %23 = arith.subf %17, %22 : vector<16x128xf32>
    %c0_13 = arith.constant 0 : index
    %c0_14 = arith.constant 0 : index
    %24 = vector.load %arg6[%c0_13, %c0_14] : memref<16x128xf32, #tpu.memory_space<vmem>>, vector<16x128xf32>
    tpu.vector_store %arg6[%c0_13, %c0_14], %23 {strides = array<i32>} : memref<16x128xf32, #tpu.memory_space<vmem>>, vector<16x128xf32>,
    return
  }
  func.func @transform_0(%arg0: i32) -> (i32, i32) {
    %c0_i32 = arith.constant 0 : i32
    %c0_i32_0 = arith.constant 0 : i32
    return %arg0, %c0_i32 : i32, i32
  }
  func.func @transform_1(%arg0: i32) -> (i32, i32) {
    %c0_i32 = arith.constant 0 : i32
    %c0_i32_0 = arith.constant 0 : i32
    %c0_i32_1 = arith.constant 0 : i32
    return %c0_i32, %c0_i32_0 : i32, i32
  }
  func.func @transform_2(%arg0: i32) -> (i32, i32) {
    %c0_i32 = arith.constant 0 : i32
    %c0_i32_0 = arith.constant 0 : i32
    %c0_i32_1 = arith.constant 0 : i32
    return %c0_i32, %c0_i32_0 : i32, i32
  }
  func.func @transform_3(%arg0: i32) -> (i32, i32) {
    %c0_i32 = arith.constant 0 : i32
    %c0_i32_0 = arith.constant 0 : i32
    %c0_i32_1 = arith.constant 0 : i32
    return %c0_i32, %c0_i32_0 : i32, i32
  }
  func.func @transform_4(%arg0: i32) -> (i32, i32) {
    %c0_i32 = arith.constant 0 : i32
    %c0_i32_0 = arith.constant 0 : i32
    %c0_i32_1 = arith.constant 0 : i32
    return %c0_i32, %c0_i32_0 : i32, i32
  }
  func.func @transform_5(%arg0: i32) -> (i32, i32) {
    %c0_i32 = arith.constant 0 : i32
    %c0_i32_0 = arith.constant 0 : i32
    return %arg0, %c0_i32 : i32, i32
  }
}

</mosaic_0001>

<bundles_post_ra>
// kernel: tpu_custom_call.1
= control target key start
LH: loop header
LB: loop body
LE: loop exit
PB: predicated region body
PF: predicated region fallthrough
CT: control target
= control target key end

     0   :  { %10 = vsyncpa [#allocation3], 0  ;;  %s3521_s0 = inlined_call_operand.hbm [shape: bf16[16,784], index: 0, kind: input, shape index: {}]   ;;  %s3522_s1 = inlined_call_operand.hbm [shape: bf16[784,512], index: 1, kind: input, shape index: {}]   ;;  %s3523_s2 = inlined_call_operand.hbm [shape: f32[1,512], index: 2, kind: input, shape index: {}]   ;;  %s3524_s3 = inlined_call_operand.hbm [shape: bf16[512,128], index: 3, kind: input, shape index: {}]   ;;  %s3525_s4 = inlined_call_operand.vmem [shape: f32[1,128], index: 4, kind: input, shape index: {}]   ;;  %s3526_s5 = inlined_call_operand.hbm [shape: f32[16,128], index: 5, kind: output, shape index: {}]  }
   0x1   :  { %11 = vsyncpa [#allocation6], 0 }
   0x2   :  { %12 = vsyncpa [#allocation9], 0  ;;  %s31_s20 = sshll.u32 %s3522_s1, 4  ;;  %s32_s20 = int_to_ptr.hbm [resolvable:$true] %s31_s20 }
   0x3   :  { %13 = vsyncpa [#allocation4], 0  ;;  %s3408_s21 = smov [#allocation5]   ;;  %s18_s25 = sshll.u32 %s3521_s0, 4  ;;  %s19_s25 = int_to_ptr.hbm [resolvable:$true] %s18_s25 }
   0x4   :  { %s33_s22 = sshll.u32 %s3408_s21, 4  ;;  %s3409_s26 = smov 256   ;;  %s34_s22 = int_to_ptr.vmem [resolvable:$true] %s33_s22 }
   0x5   :  { %s3410_s27 = smov 16   ;;  %s3411_s28 = smov [#allocation2]  }
   0x6   :  { %39 = dma.hbm_to_vmem [thread:$0]  %s32_s20, 25088, %s34_s22, [#allocation6], %s3409_s26, %s3409_s26, %s3410_s27  }
   0x7   :  { %s20_s29 = sshll.u32 %s3411_s28, 4  ;;  %s3412_s30 = smov 448   ;;  %s21_s29 = int_to_ptr.vmem [resolvable:$true] %s20_s29 }
   0x8   :  { %s3413_s6 = smov 28   ;;  %s45_s8 = sshll.u32 %s3523_s2, 4  ;;  %s46_s8 = int_to_ptr.hbm [resolvable:$true] %s45_s8 }
   0x9   :  { %26 = dma.hbm_to_vmem [thread:$0]  %s19_s25, 896, %s21_s29, [#allocation3], %s3412_s30, %s3412_s30, %s3413_s6  }
   0xa   :  { %s3414_s9 = smov [#allocation7]   ;;  %s55_s12 = sshll.u32 %s3524_s3, 4  ;;  %s56_s12 = int_to_ptr.hbm [resolvable:$true] %s55_s12 }
   0xb   :  { %s47_s10 = sshll.u32 %s3414_s9, 4  ;;  %s3415_s13 = smov [#allocation8]   ;;  %s48_s10 = int_to_ptr.vmem [resolvable:$true] %s47_s10 }
   0xc   :  { %50 = dma.hbm_to_vmem [thread:$0]  %s46_s8, 64, %s48_s10, [#allocation6]  }
   0xd   :  { %s57_s14 = sshll.u32 %s3415_s13, 4  ;;  %s3416_s15 = smov 64   ;;  %s58_s14 = int_to_ptr.vmem [resolvable:$true] %s57_s14 }
   0xe   :  { %s3417_s16 = smov 4  }
   0xf   :  { %63 = dma.hbm_to_vmem [thread:$0]  %s56_s12, 4096, %s58_s14, [#allocation9], %s3416_s15, %s3416_s15, %s3417_s16  }
  0x10   :  { %3400 = dma.done.wait [#allocation3], 896  }
  0x11   :  { %3401 = vsyncadd [#allocation3], 4294966400 }
  0x12   :  { %3402 = dma.done.wait [#allocation6], 25152  }
  0x13   :  { %3403 = vsyncadd [#allocation6], 4294942144 }
  0x14   :  { %3404 = dma.done.wait [#allocation9], 4096  }
  0x15   :  { %3405 = vsyncadd [#allocation9], 4294963200  ;;  %v2221_v0 = vld [vmem:[#allocation5 + $0xe0] sm:$0xf]  ;;  %v3060_v1 = vld [vmem:[#allocation5 + $0xec] sm:$0xf0] }
  0x16   :  { %v2349_v2 = vld [vmem:[#allocation5 + $0x1e0] sm:$0xf]  ;;  %v2222_v3 = vor.u32 %v3060_v1, %v2221_v0  ;;  %v3092_v4 = vld [vmem:[#allocation5 + $0x1ec] sm:$0xf0]  ;;  %vm1312_vm0 = vcmask 130048   ;;  %s2064_s20 = sshll.u32 %s3526_s5, 4  ;;  %s2065_s20 = int_to_ptr.hbm [resolvable:$true] %s2064_s20 }
  0x17   :  { %v2477_v5 = vld [vmem:[#allocation5 + $0x2e0] sm:$0xf]  ;;  %v3124_v6 = vld [vmem:[#allocation5 + $0x2ec] sm:$0xf0]  ;;  %v2350_v7 = vor.u32 %v3092_v4, %v2349_v2  ;;  %s3419_s21 = smov 128   ;;  %s3420_s22 = smov 8  }
  0x18   :  { %v2478_v8 = vor.u32 %v3124_v6, %v2477_v5  ;;  %v2605_v9 = vld [vmem:[#allocation5 + $0x3e0] sm:$0xf]  ;;  %v3156_v10 = vld [vmem:[#allocation5 + $0x3ec] sm:$0xf0]  ;;  %1316 = vmatpush.bf16.msra.mxu0 %v2222_v3 }
  0x19   :  { %v2205_v11 = vld [vmem:[#allocation5 + $0xc0] sm:$0xf]  ;;  %v2606_v12 = vor.u32 %v3156_v10, %v2605_v9  ;;  %v3056_v13 = vld [vmem:[#allocation5 + $0xcc] sm:$0xf0]  ;;  %1330 = vmatpush.bf16.msra.mxu1 %v2350_v7 }
  0x1a   :  { %v2333_v14 = vld [vmem:[#allocation5 + $0x1c0] sm:$0xf]  ;;  %v3088_v15 = vld [vmem:[#allocation5 + $0x1cc] sm:$0xf0]  ;;  %1344 = vmatpush.bf16.msra.mxu2 %v2478_v8  ;;  %v2206_v16 = vor.u32 %v3056_v13, %v2205_v11 }
  0x1b   :  { %v2334_v17 = vor.u32 %v3088_v15, %v2333_v14  ;;  %v2461_v18 = vld [vmem:[#allocation5 + $0x2c0] sm:$0xf]  ;;  %v3120_v19 = vld [vmem:[#allocation5 + $0x2cc] sm:$0xf0]  ;;  %1358 = vmatpush.bf16.msra.mxu3 %v2606_v12 }
  0x1c   :  { %v2589_v20 = vld [vmem:[#allocation5 + $0x3c0] sm:$0xf]  ;;  %v2462_v21 = vor.u32 %v3120_v19, %v2461_v18  ;;  %v3152_v22 = vld [vmem:[#allocation5 + $0x3cc] sm:$0xf0]  ;;  %1317 = vmatpush.bf16.msra.mxu0 %v2206_v16 }
  0x1d   :  { %v2189_v23 = vld [vmem:[#allocation5 + $0xa0] sm:$0xf]  ;;  %v3052_v24 = vld [vmem:[#allocation5 + $0xac] sm:$0xf0]  ;;  %v2590_v25 = vor.u32 %v3152_v22, %v2589_v20  ;;  %1331 = vmatpush.bf16.msra.mxu1 %v2334_v17 }
  0x1e   :  { %v2317_v26 = vld [vmem:[#allocation5 + $0x1a0] sm:$0xf]  ;;  %v3084_v27 = vld [vmem:[#allocation5 + $0x1ac] sm:$0xf0]  ;;  %v2190_v29 = vor.u32 %v3052_v24, %v2189_v23  ;;  %1345 = vmatpush.bf16.msra.mxu2 %v2462_v21 }
  0x1f   :  { %v2445_v28 = vld [vmem:[#allocation5 + $0x2a0] sm:$0xf]  ;;  %v3116_v30 = vld [vmem:[#allocation5 + $0x2ac] sm:$0xf0]  ;;  %v2318_v33 = vor.u32 %v3084_v27, %v2317_v26  ;;  %1359 = vmatpush.bf16.msra.mxu3 %v2590_v25 }
  0x20   :  { %v2573_v31 = vld [vmem:[#allocation5 + $0x3a0] sm:$0xf]  ;;  %v3148_v32 = vld [vmem:[#allocation5 + $0x3ac] sm:$0xf0]  ;;  %v2446_v34 = vor.u32 %v3116_v30, %v2445_v28  ;;  %1318 = vmatpush.bf16.msra.mxu0 %v2190_v29 }
  0x21   :  { %v2173_v35 = vld [vmem:[#allocation5 + $0x80] sm:$0xf]  ;;  %v3048_v36 = vld [vmem:[#allocation5 + $0x8c] sm:$0xf0]  ;;  %v2574_v38 = vor.u32 %v3148_v32, %v2573_v31  ;;  %1332 = vmatpush.bf16.msra.mxu1 %v2318_v33  ;;  %v3058_v32 = vld [vmem:[#allocation5 + $0xe4] sm:$0xf] }
  0x22   :  { %v2301_v37 = vld [vmem:[#allocation5 + $0x180] sm:$0xf]  ;;  %v3080_v39 = vld [vmem:[#allocation5 + $0x18c] sm:$0xf0]  ;;  %v2174_v44 = vor.u32 %v3048_v36, %v2173_v35  ;;  %1346 = vmatpush.bf16.msra.mxu2 %v2446_v34  ;;  %v2223_v33 = vld [vmem:[#allocation5 + $0xf0] sm:$0xf0] }
  0x23   :  { %v2429_v40 = vld [vmem:[#allocation5 + $0x280] sm:$0xf]  ;;  %v3112_v41 = vld [vmem:[#allocation5 + $0x28c] sm:$0xf0]  ;;  %v2302_v45 = vor.u32 %v3080_v39, %v2301_v37  ;;  %1360 = vmatpush.bf16.msra.mxu3 %v2574_v38  ;;  %v3027_v36 = vld [vmem:[#allocation2 + $0x20] sm:$0xf0] }
  0x24   :  { %v2557_v42 = vld [vmem:[#allocation5 + $0x380] sm:$0xf]  ;;  %v3144_v43 = vld [vmem:[#allocation5 + $0x38c] sm:$0xf0]  ;;  %v2430_v46 = vor.u32 %v3112_v41, %v2429_v40  ;;  %1319 = vmatpush.bf16.msra.mxu0 %v2174_v44  ;;  %v3090_v41 = vld [vmem:[#allocation5 + $0x1e4] sm:$0xf] }
  0x25   :  { %v2157_v47 = vld [vmem:[#allocation5 + $0x60] sm:$0xf]  ;;  %v3044_v48 = vld [vmem:[#allocation5 + $0x6c] sm:$0xf0]  ;;  %v2558_v50 = vor.u32 %v3144_v43, %v2557_v42  ;;  %1333 = vmatpush.bf16.msra.mxu1 %v2302_v45  ;;  %v2081_v42 = vld [vmem:[#allocation2] sm:$0xf] }
  0x26   :  { %v2285_v49 = vld [vmem:[#allocation5 + $0x160] sm:$0xf]  ;;  %v3076_v51 = vld [vmem:[#allocation5 + $0x16c] sm:$0xf0]  ;;  %v2158_v56 = vor.u32 %v3044_v48, %v2157_v47  ;;  %1347 = vmatpush.bf16.msra.mxu2 %v2430_v46  ;;  %v3026_v43 = vld [vmem:[#allocation2 + $0x18] sm:$0xf0] }
  0x27   :  { %v2413_v52 = vld [vmem:[#allocation5 + $0x260] sm:$0xf]  ;;  %v3108_v53 = vld [vmem:[#allocation5 + $0x26c] sm:$0xf0]  ;;  %v2286_v57 = vor.u32 %v3076_v51, %v2285_v49  ;;  %1361 = vmatpush.bf16.msra.mxu3 %v2558_v50  ;;  %v2351_v46 = vld [vmem:[#allocation5 + $0x1f0] sm:$0xf0]  ;;  %v2226_v50 = vor.u32 %v3058_v32, %v2223_v33 }
  0x28   :  { %v2541_v54 = vld [vmem:[#allocation5 + $0x360] sm:$0xf]  ;;  %v3140_v55 = vld [vmem:[#allocation5 + $0x36c] sm:$0xf0]  ;;  %v2414_v58 = vor.u32 %v3108_v53, %v2413_v52  ;;  %1320 = vmatpush.bf16.msra.mxu0 %v2158_v56  ;;  %v3024_v47 = vld [vmem:[#allocation2 + $0xc] sm:$0xf] }
  0x29   :  { %v2141_v59 = vld [vmem:[#allocation5 + $0x40] sm:$0xf]  ;;  %v3040_v60 = vld [vmem:[#allocation5 + $0x4c] sm:$0xf0]  ;;  %v2542_v62 = vor.u32 %v3140_v55, %v2541_v54  ;;  %1334 = vmatpush.bf16.msra.mxu1 %v2286_v57  ;;  %v3465_v55 = vor.u32 %v3026_v43, %v2081_v42  ;;  %v3054_v57 = vld [vmem:[#allocation5 + $0xc4] sm:$0xf] }
  0x2a   :  { %v2269_v61 = vld [vmem:[#allocation5 + $0x140] sm:$0xf]  ;;  %v3072_v63 = vld [vmem:[#allocation5 + $0x14c] sm:$0xf0]  ;;  %v2142_v4 = vor.u32 %v3040_v60, %v2141_v59  ;;  %1348 = vmatpush.bf16.msra.mxu2 %v2414_v58  ;;  %v2207_v58 = vld [vmem:[#allocation5 + $0xd0] sm:$0xf0] }
  0x2b   :  { %v2397_v0 = vld [vmem:[#allocation5 + $0x240] sm:$0xf]  ;;  %v3104_v1 = vld [vmem:[#allocation5 + $0x24c] sm:$0xf0]  ;;  %v2270_v6 = vor.u32 %v3072_v63, %v2269_v61  ;;  %1362 = vmatpush.bf16.msra.mxu3 %v2542_v62  ;;  %v3023_v61 = vld [vmem:[#allocation2 + $0x4] sm:$0xf]  ;;  %v2354_v63 = vor.u32 %v3090_v41, %v2351_v46 }
  0x2c   :  { %v2525_v2 = vld [vmem:[#allocation5 + $0x340] sm:$0xf]  ;;  %v3136_v3 = vld [vmem:[#allocation5 + $0x34c] sm:$0xf0]  ;;  %v2398_v7 = vor.u32 %v3104_v1, %v2397_v0  ;;  %1321 = vmatpush.bf16.msra.mxu0 %v2142_v4  ;;  %v2083_v62 = vld [vmem:[#allocation2 + $0x1c] sm:$0xf0]  ;;  %v2210_v4 = vor.u32 %v3054_v57, %v2207_v58 }
  0x2d   :  { %v2125_v5 = vld [vmem:[#allocation5 + $0x20] sm:$0xf]  ;;  %v3036_v8 = vld [vmem:[#allocation5 + $0x2c] sm:$0xf0]  ;;  %v2526_v11 = vor.u32 %v3136_v3, %v2525_v2  ;;  %1335 = vmatpush.bf16.msra.mxu1 %v2270_v6  ;;  %v3086_v1 = vld [vmem:[#allocation5 + $0x1c4] sm:$0xf] }
  0x2e   :  { %v2253_v9 = vld [vmem:[#allocation5 + $0x120] sm:$0xf]  ;;  %v3068_v10 = vld [vmem:[#allocation5 + $0x12c] sm:$0xf0]  ;;  %v2126_v18 = vor.u32 %v3036_v8, %v2125_v5  ;;  %1349 = vmatpush.bf16.msra.mxu2 %v2398_v7  ;;  %v2335_v2 = vld [vmem:[#allocation5 + $0x1d0] sm:$0xf0]  ;;  %v3471_v8 = vor.u32 %v3023_v61, %v2083_v62 }
  0x2f   :  { %v2381_v12 = vld [vmem:[#allocation5 + $0x220] sm:$0xf]  ;;  %v3100_v13 = vld [vmem:[#allocation5 + $0x22c] sm:$0xf0]  ;;  %v2254_v23 = vor.u32 %v3068_v10, %v2253_v9  ;;  %1363 = vmatpush.bf16.msra.mxu3 %v2526_v11  ;;  %v3050_v10 = vld [vmem:[#allocation5 + $0xa4] sm:$0xf] }
  0x30   :  { %v2509_v14 = vld [vmem:[#allocation5 + $0x320] sm:$0xf]  ;;  %v3132_v15 = vld [vmem:[#allocation5 + $0x32c] sm:$0xf0]  ;;  %v2382_v24 = vor.u32 %v3100_v13, %v2381_v12  ;;  %1322 = vmatpush.bf16.msra.mxu0 %v2126_v18  ;;  %v2191_v11 = vld [vmem:[#allocation5 + $0xb0] sm:$0xf0]  ;;  %v2338_v12 = vor.u32 %v3086_v1, %v2335_v2 }
  0x31   :  { %v2109_v16 = vld [vmem:[#allocation5] sm:$0xf]  ;;  %v3032_v17 = vld [vmem:[#allocation5 + $0xc] sm:$0xf0]  ;;  %v2510_v28 = vor.u32 %v3132_v15, %v2509_v14  ;;  %1336 = vmatpush.bf16.msra.mxu1 %v2254_v23  ;;  %v3082_v14 = vld [vmem:[#allocation5 + $0x1a4] sm:$0xf] }
  0x32   :  { %v2237_v19 = vld [vmem:[#allocation5 + $0x100] sm:$0xf]  ;;  %v3064_v20 = vld [vmem:[#allocation5 + $0x10c] sm:$0xf0]  ;;  %v2110_v35 = vor.u32 %v3032_v17, %v2109_v16  ;;  %1350 = vmatpush.bf16.msra.mxu2 %v2382_v24  ;;  %v2319_v15 = vld [vmem:[#allocation5 + $0x1b0] sm:$0xf0]  ;;  %v2194_v17 = vor.u32 %v3050_v10, %v2191_v11 }
  0x33   :  { %v2365_v21 = vld [vmem:[#allocation5 + $0x200] sm:$0xf]  ;;  %v3096_v22 = vld [vmem:[#allocation5 + $0x20c] sm:$0xf0]  ;;  %v2238_v39 = vor.u32 %v3064_v20, %v2237_v19  ;;  %1364 = vmatpush.bf16.msra.mxu3 %v2510_v28  ;;  %v2175_v23 = vld [vmem:[#allocation5 + $0x90] sm:$0xf0]  ;;  %v2322_v24 = vor.u32 %v3082_v14, %v2319_v15 }
  0x34   :  { %v2493_v25 = vld [vmem:[#allocation5 + $0x300] sm:$0xf]  ;;  %v3128_v26 = vld [vmem:[#allocation5 + $0x30c] sm:$0xf0]  ;;  %v2366_v40 = vor.u32 %v3096_v22, %v2365_v21  ;;  %1323 = vmatpush.bf16.msra.mxu0 %v2110_v35  ;;  %v3046_v22 = vld [vmem:[#allocation5 + $0x84] sm:$0xf] }
  0x35   :  { %v2733_v27 = vld [vmem:[#allocation5 + $0x4e0] sm:$0xf]  ;;  %v3188_v29 = vld [vmem:[#allocation5 + $0x4ec] sm:$0xf0]  ;;  %v2494_v44 = vor.u32 %v3128_v26, %v2493_v25  ;;  %1337 = vmatpush.bf16.msra.mxu1 %v2238_v39  ;;  %v3078_v26 = vld [vmem:[#allocation5 + $0x184] sm:$0xf] }
  0x36   :  { %v2861_v30 = vld [vmem:[#allocation5 + $0x5e0] sm:$0xf]  ;;  %v3220_v31 = vld [vmem:[#allocation5 + $0x5ec] sm:$0xf0]  ;;  %v2734_v45 = vor.u32 %v3188_v29, %v2733_v27  ;;  %1351 = vmatpush.bf16.msra.mxu2 %v2366_v40  ;;  %v2303_v27 = vld [vmem:[#allocation5 + $0x190] sm:$0xf0]  ;;  %v2178_v29 = vor.u32 %v3046_v22, %v2175_v23 }
  0x37   :  { %v2089_v34 = vld [vmem:[#allocation2 + $0x8] sm:$0xf]  ;;  %v2877_v37 = vld [vmem:[#allocation5 + $0x600] sm:$0xf]  ;;  %v2862_v49 = vor.u32 %v3220_v31, %v2861_v30  ;;  %1365 = vmatpush.bf16.msra.mxu3 %v2494_v44  ;;  %1324 = vmatmul.bf16.vlgmr.msra.gmra.mxu0 %v3465_v55  ;;  %v2159_v35 = vld [vmem:[#allocation5 + $0x70] sm:$0xf0] }
  0x38   :  { %v3224_v38 = vld [vmem:[#allocation5 + $0x60c] sm:$0xf0]  ;;  %v2717_v51 = vld [vmem:[#allocation5 + $0x4c0] sm:$0xf]  ;;  %v3463_v54 = vor.u32 %v3027_v36, %v2089_v34  ;;  %1372 = vmatpush.bf16.msrb.mxu0 %v2734_v45  ;;  %1338 = vmatmul.bf16.vlgmr.msra.gmra.mxu1 %v3471_v8  ;;  %v3042_v34 = vld [vmem:[#allocation5 + $0x64] sm:$0xf] }
  0x39   :  { %v2091_v48 = vld [vmem:[#allocation2 + $0x24] sm:$0xf0]  ;;  %v2845_v53 = vld [vmem:[#allocation5 + $0x5c0] sm:$0xf]  ;;  %v2878_v59 = vor.u32 %v3224_v38, %v2877_v37  ;;  %1386 = vmatpush.bf16.msrb.mxu1 %v2862_v49  ;;  %v3029_v37 = vld [vmem:[#allocation2 + $0x30] sm:$0xf0]  ;;  %v2306_v38 = vor.u32 %v3078_v26, %v2303_v27  ;;  %v2162_v43 = vor.u32 %v3042_v34, %v2159_v35 }
  0x3a   :  { %v3184_v52 = vld [vmem:[#allocation5 + $0x4cc] sm:$0xf0]  ;;  %v3467_v60 = vor.u32 %v3024_v47, %v2091_v48  ;;  %v2701_v5 = vld [vmem:[#allocation5 + $0x4a0] sm:$0xf]  ;;  %1352 = vmatmul.bf16.vlgmr.msra.gmra.mxu2 %v3463_v54  ;;  %v3074_v40 = vld [vmem:[#allocation5 + $0x164] sm:$0xf] }
  0x3b   :  { %v3216_v56 = vld [vmem:[#allocation5 + $0x5cc] sm:$0xf0]  ;;  %v2718_v0 = vor.u32 %v3184_v52, %v2717_v51  ;;  %1414 = vmatpush.bf16.msrb.mxu3 %v2226_v50  ;;  %v2829_v7 = vld [vmem:[#allocation5 + $0x5a0] sm:$0xf]  ;;  %1407 = vmatpush.bf16.msrb.mxu2 %v2878_v59  ;;  %v2287_v41 = vld [vmem:[#allocation5 + $0x170] sm:$0xf0] }
  0x3c   :  { %v2846_v3 = vor.u32 %v3216_v56, %v2845_v53  ;;  %v3180_v6 = vld [vmem:[#allocation5 + $0x4ac] sm:$0xf0]  ;;  %1366 = vmatmul.bf16.vlgmr.msra.gmra.mxu3 %v3467_v60  ;;  %v2685_v18 = vld [vmem:[#allocation5 + $0x480] sm:$0xf]  ;;  %v3038_v48 = vld [vmem:[#allocation5 + $0x44] sm:$0xf]  ;;  %v2290_v51 = vor.u32 %v3074_v40, %v2287_v41 }
  0x3d   :  { %v3212_v9 = vld [vmem:[#allocation5 + $0x5ac] sm:$0xf0]  ;;  %1373 = vmatpush.bf16.msrb.mxu0 %v2718_v0  ;;  %v2702_v13 = vor.u32 %v3180_v6, %v2701_v5  ;;  %v2813_v20 = vld [vmem:[#allocation5 + $0x580] sm:$0xf]  ;;  %v2143_v49 = vld [vmem:[#allocation5 + $0x50] sm:$0xf0] }
  0x3e   :  { %1387 = vmatpush.bf16.msrb.mxu1 %v2846_v3  ;;  %v2830_v16 = vor.u32 %v3212_v9, %v2829_v7  ;;  %v3176_v19 = vld [vmem:[#allocation5 + $0x48c] sm:$0xf0]  ;;  %v2669_v30 = vld [vmem:[#allocation5 + $0x460] sm:$0xf]  ;;  %v3070_v53 = vld [vmem:[#allocation5 + $0x144] sm:$0xf]  ;;  %v2146_v58 = vor.u32 %v3038_v48, %v2143_v49 }
  0x3f   :  { %1428 = vmatpush.bf16.msra.mxu2 %v2354_v63  ;;  %1415 = vmatpush.bf16.msrb.mxu3 %v2210_v4  ;;  %v3208_v21 = vld [vmem:[#allocation5 + $0x58c] sm:$0xf0]  ;;  %v2686_v25 = vor.u32 %v3176_v19, %v2685_v18  ;;  %v2797_v32 = vld [vmem:[#allocation5 + $0x560] sm:$0xf]  ;;  %v2271_v56 = vld [vmem:[#allocation5 + $0x150] sm:$0xf0] }
  0x40   :  { %v2814_v28 = vor.u32 %v3208_v21, %v2813_v20  ;;  %v3172_v31 = vld [vmem:[#allocation5 + $0x46c] sm:$0xf0]  ;;  %v2105_v36 = vld [vmem:[#allocation2 + $0x18] sm:$0xf]  ;;  %v3034_v0 = vld [vmem:[#allocation5 + $0x24] sm:$0xf]  ;;  %v2274_v4 = vor.u32 %v3070_v53, %v2271_v56 }
  0x41   :  { %1374 = vmatpush.bf16.msrb.mxu0 %v2702_v13  ;;  %v3204_v33 = vld [vmem:[#allocation5 + $0x56c] sm:$0xf0]  ;;  %v2670_v39 = vor.u32 %v3172_v31, %v2669_v30  ;;  %v2653_v44 = vld [vmem:[#allocation5 + $0x440] sm:$0xf]  ;;  %v3475_v50 = vor.u32 %v3029_v37, %v2105_v36  ;;  %v2127_v1 = vld [vmem:[#allocation5 + $0x30] sm:$0xf0] }
  0x42   :  { %1388 = vmatpush.bf16.msrb.mxu1 %v2830_v16  ;;  %v2798_v42 = vor.u32 %v3204_v33, %v2797_v32  ;;  %v3168_v45 = vld [vmem:[#allocation5 + $0x44c] sm:$0xf0]  ;;  %v2781_v46 = vld [vmem:[#allocation5 + $0x540] sm:$0xf]  ;;  %v3066_v2 = vld [vmem:[#allocation5 + $0x124] sm:$0xf]  ;;  %v2130_v11 = vor.u32 %v3034_v0, %v2127_v1 }
  0x43   :  { %1429 = vmatpush.bf16.msra.mxu2 %v2338_v12  ;;  %1416 = vmatpush.bf16.msrb.mxu3 %v2194_v17  ;;  %v3200_v47 = vld [vmem:[#allocation5 + $0x54c] sm:$0xf0]  ;;  %v2654_v52 = vor.u32 %v3168_v45, %v2653_v44  ;;  %v2637_v59 = vld [vmem:[#allocation5 + $0x420] sm:$0xf]  ;;  %v2255_v3 = vld [vmem:[#allocation5 + $0x130] sm:$0xf0] }
  0x44   :  { %v2782_v57 = vor.u32 %v3200_v47, %v2781_v46  ;;  %v3164_v61 = vld [vmem:[#allocation5 + $0x42c] sm:$0xf0]  ;;  %v2765_v62 = vld [vmem:[#allocation5 + $0x520] sm:$0xf]  ;;  %v3030_v13 = vld [vmem:[#allocation5 + $0x4] sm:$0xf]  ;;  %v2258_v21 = vor.u32 %v3066_v2, %v2255_v3 }
  0x45   :  { %1375 = vmatpush.bf16.msrb.mxu0 %v2686_v25  ;;  %v3196_v63 = vld [vmem:[#allocation5 + $0x52c] sm:$0xf0]  ;;  %v2638_v5 = vor.u32 %v3164_v61, %v2637_v59  ;;  %v2621_v6 = vld [vmem:[#allocation5 + $0x400] sm:$0xf]  ;;  %v2111_v14 = vld [vmem:[#allocation5 + $0x10] sm:$0xf0] }
  0x46   :  { %1389 = vmatpush.bf16.msrb.mxu1 %v2814_v28  ;;  %v3160_v7 = vld [vmem:[#allocation5 + $0x40c] sm:$0xf0]  ;;  %v2749_v9 = vld [vmem:[#allocation5 + $0x500] sm:$0xf]  ;;  %v2766_v10 = vor.u32 %v3196_v63, %v2765_v62  ;;  %v3122_v15 = vld [vmem:[#allocation5 + $0x2e4] sm:$0xf]  ;;  %v2114_v27 = vor.u32 %v3030_v13, %v2111_v14 }
  0x47   :  { %1430 = vmatpush.bf16.msra.mxu2 %v2322_v24  ;;  %1417 = vmatpush.bf16.msrb.mxu3 %v2178_v29  ;;  %v3192_v12 = vld [vmem:[#allocation5 + $0x50c] sm:$0xf0]  ;;  %v2479_v16 = vld [vmem:[#allocation5 + $0x2f0] sm:$0xf0]  ;;  %v3154_v17 = vld [vmem:[#allocation5 + $0x3e4] sm:$0xf]  ;;  %v2622_v22 = vor.u32 %v3160_v7, %v2621_v6 }
  0x48   :  { %v2607_v18 = vld [vmem:[#allocation5 + $0x3f0] sm:$0xf0]  ;;  %v3186_v19 = vld [vmem:[#allocation5 + $0x4e4] sm:$0xf]  ;;  %v2097_v23 = vld [vmem:[#allocation2 + $0x10] sm:$0xf]  ;;  %v2750_v26 = vor.u32 %v3192_v12, %v2749_v9  ;;  %v2482_v31 = vor.u32 %v3122_v15, %v2479_v16 }
  0x49   :  { %1376 = vmatpush.bf16.msrb.mxu0 %v2670_v39  ;;  %v2735_v20 = vld [vmem:[#allocation5 + $0x4f0] sm:$0xf0]  ;;  %v3062_v25 = vld [vmem:[#allocation5 + $0x104] sm:$0xf]  ;;  %v3025_v29 = vld [vmem:[#allocation2 + $0x14] sm:$0xf]  ;;  %v2610_v32 = vor.u32 %v3154_v17, %v2607_v18 }
  0x4a   :  { %1390 = vmatpush.bf16.msrb.mxu1 %v2798_v42  ;;  %2891 = vmatmul.msk.bf16.vlgmr.msrb.gmra.mxu2 %vm1312_vm0, %v3475_v50  ;;  %v3028_v24 = vld [vmem:[#allocation2 + $0x28] sm:$0xf0]  ;;  %v2099_v30 = vld [vmem:[#allocation2 + $0x2c] sm:$0xf0]  ;;  %v3218_v33 = vld [vmem:[#allocation5 + $0x5e4] sm:$0xf]  ;;  %v2738_v36 = vor.u32 %v3186_v19, %v2735_v20 }
  0x4b   :  { %1431 = vmatpush.bf16.msra.mxu2 %v2306_v38  ;;  %1418 = vmatpush.bf16.msrb.mxu3 %v2162_v43  ;;  %v2239_v28 = vld [vmem:[#allocation5 + $0x110] sm:$0xf0]  ;;  %v3118_v35 = vld [vmem:[#allocation5 + $0x2c4] sm:$0xf]  ;;  %v3479_v37 = vor.u32 %v3028_v24, %v2097_v23  ;;  %v3481_v42 = vor.u32 %v3025_v29, %v2099_v30 }
  0x4c   :  { %v2863_v34 = vld [vmem:[#allocation5 + $0x5f0] sm:$0xf0]  ;;  %v3150_v39 = vld [vmem:[#allocation5 + $0x3c4] sm:$0xf]  ;;  %v2242_v41 = vor.u32 %v3062_v25, %v2239_v28 }
  0x4d   :  { %1377 = vmatpush.bf16.msrb.mxu0 %v2654_v52  ;;  %v2463_v38 = vld [vmem:[#allocation5 + $0x2d0] sm:$0xf0]  ;;  %v3182_v43 = vld [vmem:[#allocation5 + $0x4c4] sm:$0xf]  ;;  %v2866_v45 = vor.u32 %v3218_v33, %v2863_v34 }
  0x4e   :  { %1391 = vmatpush.bf16.msrb.mxu1 %v2782_v57  ;;  %v2591_v40 = vld [vmem:[#allocation5 + $0x3d0] sm:$0xf0]  ;;  %v2466_v46 = vor.u32 %v3118_v35, %v2463_v38  ;;  %v3214_v48 = vld [vmem:[#allocation5 + $0x5c4] sm:$0xf] }
  0x4f   :  { %1432 = vmatpush.bf16.msra.mxu2 %v2290_v51  ;;  %1419 = vmatpush.bf16.msrb.mxu3 %v2146_v58  ;;  %v2719_v44 = vld [vmem:[#allocation5 + $0x4d0] sm:$0xf0]  ;;  %v2594_v47 = vor.u32 %v3150_v39, %v2591_v40  ;;  %v3114_v51 = vld [vmem:[#allocation5 + $0x2a4] sm:$0xf] }
  0x50   :  { %v2847_v49 = vld [vmem:[#allocation5 + $0x5d0] sm:$0xf0]  ;;  %v2722_v52 = vor.u32 %v3182_v43, %v2719_v44  ;;  %v3146_v56 = vld [vmem:[#allocation5 + $0x3a4] sm:$0xf] }
  0x51   :  { %1378 = vmatpush.bf16.msrb.mxu0 %v2638_v5  ;;  %v2447_v53 = vld [vmem:[#allocation5 + $0x2b0] sm:$0xf0]  ;;  %v3178_v58 = vld [vmem:[#allocation5 + $0x4a4] sm:$0xf]  ;;  %v2850_v61 = vor.u32 %v3214_v48, %v2847_v49 }
  0x52   :  { %1392 = vmatpush.bf16.msrb.mxu1 %v2766_v10  ;;  %v2575_v57 = vld [vmem:[#allocation5 + $0x3b0] sm:$0xf0]  ;;  %v2450_v62 = vor.u32 %v3114_v51, %v2447_v53  ;;  %v3210_v0 = vld [vmem:[#allocation5 + $0x5a4] sm:$0xf] }
  0x53   :  { %1433 = vmatpush.bf16.msra.mxu2 %v2274_v4  ;;  %1420 = vmatpush.bf16.msrb.mxu3 %v2130_v11  ;;  %v2703_v59 = vld [vmem:[#allocation5 + $0x4b0] sm:$0xf0]  ;;  %v2578_v63 = vor.u32 %v3146_v56, %v2575_v57  ;;  %v3110_v2 = vld [vmem:[#allocation5 + $0x284] sm:$0xf] }
  0x54   :  { %v2831_v1 = vld [vmem:[#allocation5 + $0x5b0] sm:$0xf0]  ;;  %v2706_v3 = vor.u32 %v3178_v58, %v2703_v59  ;;  %v3142_v5 = vld [vmem:[#allocation5 + $0x384] sm:$0xf] }
  0x55   :  { %1379 = vmatpush.bf16.msrb.mxu0 %v2622_v22  ;;  %v2431_v4 = vld [vmem:[#allocation5 + $0x290] sm:$0xf0]  ;;  %v3174_v7 = vld [vmem:[#allocation5 + $0x484] sm:$0xf]  ;;  %v2834_v10 = vor.u32 %v3210_v0, %v2831_v1  ;;  %v2229_v0 = vld [vmem:[#allocation5 + $0xe8] sm:$0xf] }
  0x56   :  { %1393 = vmatpush.bf16.msrb.mxu1 %v2750_v26  ;;  %v2559_v6 = vld [vmem:[#allocation5 + $0x390] sm:$0xf0]  ;;  %v2434_v11 = vor.u32 %v3110_v2, %v2431_v4  ;;  %v3206_v13 = vld [vmem:[#allocation5 + $0x584] sm:$0xf]  ;;  %v3061_v1 = vld [vmem:[#allocation5 + $0xf4] sm:$0xf0] }
  0x57   :  { %1434 = vmatpush.bf16.msra.mxu2 %v2258_v21  ;;  %1421 = vmatpush.bf16.msrb.mxu3 %v2114_v27  ;;  %v2687_v9 = vld [vmem:[#allocation5 + $0x490] sm:$0xf0]  ;;  %v2562_v12 = vor.u32 %v3142_v5, %v2559_v6  ;;  %v3106_v15 = vld [vmem:[#allocation5 + $0x264] sm:$0xf]  ;;  %v2485_v5 = vld [vmem:[#allocation5 + $0x2e8] sm:$0xf] }
  0x58   :  { %1380 = vmatmul.bf16.vlgmr.msrb.gmra.mxu0 %v3479_v37  ;;  %v2815_v14 = vld [vmem:[#allocation5 + $0x590] sm:$0xf0]  ;;  %v2690_v16 = vor.u32 %v3174_v7, %v2687_v9  ;;  %v3138_v18 = vld [vmem:[#allocation5 + $0x364] sm:$0xf]  ;;  %v3125_v6 = vld [vmem:[#allocation5 + $0x2f4] sm:$0xf0] }
  0x59   :  { %1442 = vmatpush.bf16.msra.mxu0 %v2482_v31  ;;  %1394 = vmatmul.bf16.vlgmr.msrb.gmra.mxu1 %v3481_v42  ;;  %v2415_v17 = vld [vmem:[#allocation5 + $0x270] sm:$0xf0]  ;;  %v3170_v20 = vld [vmem:[#allocation5 + $0x464] sm:$0xf]  ;;  %v2818_v22 = vor.u32 %v3206_v13, %v2815_v14  ;;  %v2230_v13 = vor.u32 %v3061_v1, %v2229_v0  ;;  %v2613_v14 = vld [vmem:[#allocation5 + $0x3e8] sm:$0xf] }
  0x5a   :  { %1456 = vmatpush.bf16.msra.mxu1 %v2610_v32  ;;  %1422 = vmatmul.bf16.vlgmr.msrb.gmra.mxu3 %v3465_v55  ;;  %v2543_v19 = vld [vmem:[#allocation5 + $0x370] sm:$0xf0]  ;;  %v2418_v23 = vor.u32 %v3106_v15, %v2415_v17  ;;  %v3202_v25 = vld [vmem:[#allocation5 + $0x564] sm:$0xf]  ;;  %v3157_v15 = vld [vmem:[#allocation5 + $0x3f4] sm:$0xf0] }
  0x5b   :  { %1470 = vmatpush.bf16.msra.mxu3 %v2738_v36  ;;  %1435 = vmatpush.bf16.msra.mxu2 %v2242_v41  ;;  %v2671_v21 = vld [vmem:[#allocation5 + $0x470] sm:$0xf0]  ;;  %v2546_v24 = vor.u32 %v3138_v18, %v2543_v19  ;;  %v3102_v27 = vld [vmem:[#allocation5 + $0x244] sm:$0xf]  ;;  %v2357_v17 = vld [vmem:[#allocation5 + $0x1e8] sm:$0xf]  ;;  %v2486_v19 = vor.u32 %v3125_v6, %v2485_v5 }
  0x5c   :  { %v2799_v26 = vld [vmem:[#allocation5 + $0x570] sm:$0xf0]  ;;  %v2674_v28 = vor.u32 %v3170_v20, %v2671_v21  ;;  %v3134_v30 = vld [vmem:[#allocation5 + $0x344] sm:$0xf]  ;;  %v3093_v18 = vld [vmem:[#allocation5 + $0x1f4] sm:$0xf0] }
  0x5d   :  { %1443 = vmatpush.bf16.msra.mxu0 %v2466_v46  ;;  %v2399_v29 = vld [vmem:[#allocation5 + $0x250] sm:$0xf0]  ;;  %v3166_v32 = vld [vmem:[#allocation5 + $0x444] sm:$0xf]  ;;  %v2802_v34 = vor.u32 %v3202_v25, %v2799_v26  ;;  %v2213_v21 = vld [vmem:[#allocation5 + $0xc8] sm:$0xf]  ;;  %v2358_v26 = vor.u32 %v3093_v18, %v2357_v17 }
  0x5e   :  { %1457 = vmatpush.bf16.msra.mxu1 %v2594_v47  ;;  %1436 = vmatmul.bf16.vlgmr.msra.gmra.mxu2 %v3471_v8  ;;  %v2527_v31 = vld [vmem:[#allocation5 + $0x350] sm:$0xf0]  ;;  %v2402_v35 = vor.u32 %v3102_v27, %v2399_v29  ;;  %v3198_v38 = vld [vmem:[#allocation5 + $0x544] sm:$0xf]  ;;  %v3121_v25 = vld [vmem:[#allocation5 + $0x2d4] sm:$0xf0] }
  0x5f   :  { %1484 = vmatpush.bf16.msrb.mxu2 %v2866_v45  ;;  %1471 = vmatpush.bf16.msra.mxu3 %v2722_v52  ;;  %v2655_v33 = vld [vmem:[#allocation5 + $0x450] sm:$0xf0]  ;;  %v2530_v36 = vor.u32 %v3134_v30, %v2527_v31  ;;  %v3098_v40 = vld [vmem:[#allocation5 + $0x224] sm:$0xf]  ;;  %v2597_v27 = vld [vmem:[#allocation5 + $0x3c8] sm:$0xf] }
  0x60   :  { %v2783_v39 = vld [vmem:[#allocation5 + $0x550] sm:$0xf0]  ;;  %v2658_v41 = vor.u32 %v3166_v32, %v2655_v33  ;;  %v3130_v44 = vld [vmem:[#allocation5 + $0x324] sm:$0xf]  ;;  %v2341_v30 = vld [vmem:[#allocation5 + $0x1c8] sm:$0xf] }
  0x61   :  { %1444 = vmatpush.bf16.msra.mxu0 %v2450_v62  ;;  %v2383_v43 = vld [vmem:[#allocation5 + $0x230] sm:$0xf0]  ;;  %v3162_v46 = vld [vmem:[#allocation5 + $0x424] sm:$0xf]  ;;  %v2786_v48 = vor.u32 %v3198_v38, %v2783_v39  ;;  %v3089_v31 = vld [vmem:[#allocation5 + $0x1d4] sm:$0xf0] }
  0x62   :  { %1458 = vmatpush.bf16.msra.mxu1 %v2578_v63  ;;  %v2511_v45 = vld [vmem:[#allocation5 + $0x330] sm:$0xf0]  ;;  %v3194_v49 = vld [vmem:[#allocation5 + $0x524] sm:$0xf]  ;;  %v2386_v52 = vor.u32 %v3098_v40, %v2383_v43  ;;  %v2197_v33 = vld [vmem:[#allocation5 + $0xa8] sm:$0xf]  ;;  %v2342_v39 = vor.u32 %v3089_v31, %v2341_v30 }
  0x63   :  { %1485 = vmatpush.bf16.msrb.mxu2 %v2850_v61  ;;  %1472 = vmatpush.bf16.msra.mxu3 %v2706_v3  ;;  %v2639_v47 = vld [vmem:[#allocation5 + $0x430] sm:$0xf0]  ;;  %v2514_v53 = vor.u32 %v3130_v44, %v2511_v45  ;;  %v3094_v56 = vld [vmem:[#allocation5 + $0x204] sm:$0xf]  ;;  %v3117_v38 = vld [vmem:[#allocation5 + $0x2b4] sm:$0xf0] }
  0x64   :  { %v2767_v51 = vld [vmem:[#allocation5 + $0x530] sm:$0xf0]  ;;  %v3126_v58 = vld [vmem:[#allocation5 + $0x304] sm:$0xf]  ;;  %v2642_v59 = vor.u32 %v3162_v46, %v2639_v47  ;;  %v2581_v40 = vld [vmem:[#allocation5 + $0x3a8] sm:$0xf] }
  0x65   :  { %1445 = vmatpush.bf16.msra.mxu0 %v2434_v11  ;;  %v2367_v57 = vld [vmem:[#allocation5 + $0x210] sm:$0xf0]  ;;  %v3158_v62 = vld [vmem:[#allocation5 + $0x404] sm:$0xf]  ;;  %v2770_v3 = vor.u32 %v3194_v49, %v2767_v51  ;;  %v2325_v44 = vld [vmem:[#allocation5 + $0x1a8] sm:$0xf] }
  0x66   :  { %1459 = vmatpush.bf16.msra.mxu1 %v2562_v12  ;;  %v2495_v61 = vld [vmem:[#allocation5 + $0x310] sm:$0xf0]  ;;  %v3222_v2 = vld [vmem:[#allocation5 + $0x604] sm:$0xf]  ;;  %v2370_v7 = vor.u32 %v3094_v56, %v2367_v57  ;;  %v3085_v45 = vld [vmem:[#allocation5 + $0x1b4] sm:$0xf0] }
  0x67   :  { %1486 = vmatpush.bf16.msrb.mxu2 %v2834_v10  ;;  %1473 = vmatpush.bf16.msra.mxu3 %v2690_v16  ;;  %v2623_v63 = vld [vmem:[#allocation5 + $0x410] sm:$0xf0]  ;;  %v2498_v9 = vor.u32 %v3126_v58, %v2495_v61  ;;  %v3190_v10 = vld [vmem:[#allocation5 + $0x504] sm:$0xf]  ;;  %v2181_v47 = vld [vmem:[#allocation5 + $0x88] sm:$0xf] }
  0x68   :  { %v2879_v4 = vld [vmem:[#allocation5 + $0x610] sm:$0xf0]  ;;  %v2626_v12 = vor.u32 %v3158_v62, %v2623_v63  ;;  %v2437_v51 = vld [vmem:[#allocation5 + $0x288] sm:$0xf]  ;;  %v3145_v57 = vld [vmem:[#allocation5 + $0x394] sm:$0xf0] }
  0x69   :  { %1446 = vmatpush.bf16.msra.mxu0 %v2418_v23  ;;  %v2751_v11 = vld [vmem:[#allocation5 + $0x510] sm:$0xf0]  ;;  %v2882_v16 = vor.u32 %v3222_v2, %v2879_v4  ;;  %v2614_v23 = vor.u32 %v3157_v15, %v2613_v14  ;;  %v2565_v56 = vld [vmem:[#allocation5 + $0x388] sm:$0xf]  ;;  %v3081_v61 = vld [vmem:[#allocation5 + $0x194] sm:$0xf0] }
  0x6a   :  { %1460 = vmatpush.bf16.msra.mxu1 %v2546_v24  ;;  %v2754_v20 = vor.u32 %v3190_v10, %v2751_v11  ;;  %v2469_v24 = vld [vmem:[#allocation5 + $0x2c8] sm:$0xf]  ;;  %v3045_v0 = vld [vmem:[#allocation5 + $0x74] sm:$0xf0]  ;;  %v2566_v1 = vor.u32 %v3145_v57, %v2565_v56  ;;  %v3059_v56 = vld [vmem:[#allocation5 + $0xec] sm:$0xf] }
  0x6b   :  { %1487 = vmatpush.bf16.msrb.mxu2 %v2818_v22  ;;  %1474 = vmatpush.bf16.msra.mxu3 %v2674_v28  ;;  %v3057_v22 = vld [vmem:[#allocation5 + $0xd4] sm:$0xf0]  ;;  %v2470_v32 = vor.u32 %v3121_v25, %v2469_v24  ;;  %v2165_v63 = vld [vmem:[#allocation5 + $0x68] sm:$0xf]  ;;  %v2231_v57 = vld [vmem:[#allocation5 + $0xf8] sm:$0xf0] }
  0x6c   :  { %v3153_v28 = vld [vmem:[#allocation5 + $0x3d4] sm:$0xf0]  ;;  %v2214_v29 = vor.u32 %v3057_v22, %v2213_v21  ;;  %v2421_v2 = vld [vmem:[#allocation5 + $0x268] sm:$0xf] }
  0x6d   :  { %1447 = vmatpush.bf16.msra.mxu0 %v2402_v35  ;;  %v2598_v35 = vor.u32 %v3153_v28, %v2597_v27  ;;  %v2549_v5 = vld [vmem:[#allocation5 + $0x368] sm:$0xf]  ;;  %v3141_v6 = vld [vmem:[#allocation5 + $0x374] sm:$0xf0] }
  0x6e   :  { %1461 = vmatpush.bf16.msra.mxu1 %v2530_v36  ;;  %v2453_v36 = vld [vmem:[#allocation5 + $0x2a8] sm:$0xf]  ;;  %v3077_v10 = vld [vmem:[#allocation5 + $0x174] sm:$0xf0]  ;;  %v2550_v14 = vor.u32 %v3141_v6, %v2549_v5  ;;  %v2234_v6 = vor.u32 %v3059_v56, %v2231_v57 }
  0x6f   :  { %1488 = vmatpush.bf16.msrb.mxu2 %v2802_v34  ;;  %1475 = vmatpush.bf16.msra.mxu3 %v2658_v41  ;;  %v3053_v34 = vld [vmem:[#allocation5 + $0xb4] sm:$0xf0]  ;;  %v2454_v46 = vor.u32 %v3117_v38, %v2453_v36  ;;  %v2405_v15 = vld [vmem:[#allocation5 + $0x248] sm:$0xf] }
  0x70   :  { %v3149_v41 = vld [vmem:[#allocation5 + $0x3b4] sm:$0xf0]  ;;  %v2198_v43 = vor.u32 %v3053_v34, %v2197_v33  ;;  %v2533_v18 = vld [vmem:[#allocation5 + $0x348] sm:$0xf] }
  0x71   :  { %1448 = vmatpush.bf16.msra.mxu0 %v2386_v52  ;;  %v2582_v49 = vor.u32 %v3149_v41, %v2581_v40  ;;  %v3113_v52 = vld [vmem:[#allocation5 + $0x294] sm:$0xf0]  ;;  %v2277_v21 = vld [vmem:[#allocation5 + $0x148] sm:$0xf] }
  0x72   :  { %1462 = vmatpush.bf16.msra.mxu1 %v2514_v53  ;;  %v2326_v53 = vor.u32 %v3085_v45, %v2325_v44  ;;  %v2438_v62 = vor.u32 %v3113_v52, %v2437_v51  ;;  %v3073_v22 = vld [vmem:[#allocation5 + $0x154] sm:$0xf0]  ;;  %v2133_v24 = vld [vmem:[#allocation5 + $0x28] sm:$0xf] }
  0x73   :  { %1489 = vmatpush.bf16.msrb.mxu2 %v2786_v48  ;;  %1476 = vmatpush.bf16.msra.mxu3 %v2642_v59  ;;  %v3049_v48 = vld [vmem:[#allocation5 + $0x94] sm:$0xf0]  ;;  %v2309_v59 = vld [vmem:[#allocation5 + $0x188] sm:$0xf] }
  0x74   :  { %v2182_v58 = vor.u32 %v3049_v48, %v2181_v47  ;;  %v2310_v4 = vor.u32 %v3081_v61, %v2309_v59  ;;  %v3037_v25 = vld [vmem:[#allocation5 + $0x34] sm:$0xf0]  ;;  %v2389_v27 = vld [vmem:[#allocation5 + $0x228] sm:$0xf] }
  0x75   :  { %1449 = vmatpush.bf16.msra.mxu0 %v2370_v7  ;;  %v2166_v7 = vor.u32 %v3045_v0, %v2165_v63  ;;  %v3101_v28 = vld [vmem:[#allocation5 + $0x234] sm:$0xf0]  ;;  %v2517_v30 = vld [vmem:[#allocation5 + $0x328] sm:$0xf] }
  0x76   :  { %1463 = vmatpush.bf16.msra.mxu1 %v2498_v9  ;;  %v2293_v9 = vld [vmem:[#allocation5 + $0x168] sm:$0xf]  ;;  %v3133_v31 = vld [vmem:[#allocation5 + $0x334] sm:$0xf0]  ;;  %v2390_v36 = vor.u32 %v3101_v28, %v2389_v27 }
  0x77   :  { %1490 = vmatpush.bf16.msrb.mxu2 %v2770_v3  ;;  %1477 = vmatpush.bf16.msra.mxu3 %v2626_v12  ;;  %v3109_v3 = vld [vmem:[#allocation5 + $0x274] sm:$0xf0]  ;;  %v2149_v12 = vld [vmem:[#allocation5 + $0x48] sm:$0xf]  ;;  %v2294_v17 = vor.u32 %v3077_v10, %v2293_v9  ;;  %v2518_v41 = vor.u32 %v3133_v31, %v2517_v30  ;;  %v3055_v9 = vld [vmem:[#allocation5 + $0xcc] sm:$0xf] }
  0x78   :  { %1450 = vmatmul.bf16.vlgmr.msra.gmra.mxu0 %v3463_v54  ;;  %v2422_v11 = vor.u32 %v3109_v3, %v2421_v2  ;;  %v2261_v33 = vld [vmem:[#allocation5 + $0x128] sm:$0xf]  ;;  %v3069_v34 = vld [vmem:[#allocation5 + $0x134] sm:$0xf0]  ;;  %v3091_v3 = vld [vmem:[#allocation5 + $0x1ec] sm:$0xf] }
  0x79   :  { %1540 = vmatpush.bf16.msrb.mxu0 %v2486_v19  ;;  %1464 = vmatmul.bf16.vlgmr.msra.gmra.mxu1 %v3467_v60  ;;  %v3137_v19 = vld [vmem:[#allocation5 + $0x354] sm:$0xf0]  ;;  %v2373_v44 = vld [vmem:[#allocation5 + $0x208] sm:$0xf]  ;;  %v2262_v47 = vor.u32 %v3069_v34, %v2261_v33  ;;  %v2215_v10 = vld [vmem:[#allocation5 + $0xd8] sm:$0xf0] }
  0x7a   :  { %1512 = vmatpush.bf16.msrb.mxu1 %v2230_v13  ;;  %1478 = vmatmul.bf16.vlgmr.msra.gmra.mxu3 %v3479_v37  ;;  %v3041_v13 = vld [vmem:[#allocation5 + $0x54] sm:$0xf0]  ;;  %v2869_v61 = vld [vmem:[#allocation5 + $0x5e8] sm:$0xf]  ;;  %v2327_v30 = vld [vmem:[#allocation5 + $0x1b8] sm:$0xf0] }
  0x7b   :  { %1505 = vmatpush.bf16.msrb.mxu3 %v2882_v16  ;;  %1491 = vmatpush.bf16.msrb.mxu2 %v2754_v20  ;;  %v3105_v16 = vld [vmem:[#allocation5 + $0x254] sm:$0xf0]  ;;  %v2150_v20 = vor.u32 %v3041_v13, %v2149_v12  ;;  %v2725_v63 = vld [vmem:[#allocation5 + $0x4c8] sm:$0xf]  ;;  %v3047_v33 = vld [vmem:[#allocation5 + $0x8c] sm:$0xf] }
  0x7c   :  { %v3033_v38 = vld [vmem:[#allocation5 + $0x14] sm:$0xf0]  ;;  %v2853_v13 = vld [vmem:[#allocation5 + $0x5c8] sm:$0xf]  ;;  %v2183_v34 = vld [vmem:[#allocation5 + $0x98] sm:$0xf0] }
  0x7d   :  { %1541 = vmatpush.bf16.msrb.mxu0 %v2470_v32  ;;  %v2134_v32 = vor.u32 %v3037_v25, %v2133_v24  ;;  %v3189_v40 = vld [vmem:[#allocation5 + $0x4f4] sm:$0xf0]  ;;  %v2837_v25 = vld [vmem:[#allocation5 + $0x5a8] sm:$0xf] }
  0x7e   :  { %1513 = vmatpush.bf16.msrb.mxu1 %v2214_v29  ;;  %1492 = vmatmul.bf16.vlgmr.msrb.gmra.mxu2 %v3481_v42  ;;  %v2278_v29 = vor.u32 %v3073_v22, %v2277_v21  ;;  %v3097_v45 = vld [vmem:[#allocation5 + $0x214] sm:$0xf0]  ;;  %v3051_v21 = vld [vmem:[#allocation5 + $0xac] sm:$0xf]  ;;  %v2199_v22 = vld [vmem:[#allocation5 + $0xb8] sm:$0xf0] }
  0x7f   :  { %1554 = vmatpush.bf16.msra.mxu2 %v2614_v23  ;;  %1526 = vmatpush.bf16.msra.mxu3 %v2358_v26  ;;  %v2406_v23 = vor.u32 %v3105_v16, %v2405_v15  ;;  %v2534_v26 = vor.u32 %v3137_v19, %v2533_v18  ;;  %v3129_v48 = vld [vmem:[#allocation5 + $0x314] sm:$0xf0]  ;;  %v2374_v59 = vor.u32 %v3097_v45, %v2373_v44  ;;  %v2709_v15 = vld [vmem:[#allocation5 + $0x4a8] sm:$0xf]  ;;  %v2343_v18 = vld [vmem:[#allocation5 + $0x1d8] sm:$0xf0] }
  0x80   :  { %v3225_v51 = vld [vmem:[#allocation5 + $0x614] sm:$0xf0]  ;;  %v2218_v19 = vor.u32 %v3055_v9, %v2215_v10  ;;  %v2693_v27 = vld [vmem:[#allocation5 + $0x488] sm:$0xf]  ;;  %v2202_v31 = vor.u32 %v3051_v21, %v2199_v22  ;;  %v2311_v44 = vld [vmem:[#allocation5 + $0x198] sm:$0xf0]  ;;  %v2186_v45 = vor.u32 %v3047_v33, %v2183_v34 }
  0x81   :  { %1542 = vmatpush.bf16.msrb.mxu0 %v2454_v46  ;;  %v2501_v46 = vld [vmem:[#allocation5 + $0x308] sm:$0xf]  ;;  %v3181_v16 = vld [vmem:[#allocation5 + $0x4b4] sm:$0xf0]  ;;  %v2279_v9 = vld [vmem:[#allocation5 + $0x158] sm:$0xf0] }
  0x82   :  { %1514 = vmatpush.bf16.msrb.mxu1 %v2198_v43  ;;  %v2245_v43 = vld [vmem:[#allocation5 + $0x108] sm:$0xf]  ;;  %v2502_v0 = vor.u32 %v3129_v48, %v2501_v46  ;;  %v3177_v28 = vld [vmem:[#allocation5 + $0x494] sm:$0xf0]  ;;  %v2167_v48 = vld [vmem:[#allocation5 + $0x78] sm:$0xf0] }
  0x83   :  { %1555 = vmatpush.bf16.msra.mxu2 %v2598_v35  ;;  %1527 = vmatpush.bf16.msra.mxu3 %v2342_v39  ;;  %v2117_v35 = vld [vmem:[#allocation5 + $0x8] sm:$0xf]  ;;  %v3169_v57 = vld [vmem:[#allocation5 + $0x454] sm:$0xf0]  ;;  %v2263_v21 = vld [vmem:[#allocation5 + $0x138] sm:$0xf0] }
  0x84   :  { %v2741_v39 = vld [vmem:[#allocation5 + $0x4e8] sm:$0xf]  ;;  %v2118_v52 = vor.u32 %v3033_v38, %v2117_v35  ;;  %v2694_v35 = vor.u32 %v3177_v28, %v2693_v27  ;;  %v3031_v27 = vld [vmem:[#allocation5 + $0xc] sm:$0xf]  ;;  %v2119_v28 = vld [vmem:[#allocation5 + $0x18] sm:$0xf0] }
  0x85   :  { %1543 = vmatpush.bf16.msrb.mxu0 %v2438_v62  ;;  %v3221_v62 = vld [vmem:[#allocation5 + $0x5f4] sm:$0xf0]  ;;  %v2821_v38 = vld [vmem:[#allocation5 + $0x588] sm:$0xf]  ;;  %v2615_v33 = vld [vmem:[#allocation5 + $0x3f8] sm:$0xf0] }
  0x86   :  { %1515 = vmatpush.bf16.msrb.mxu1 %v2182_v58  ;;  %v2742_v58 = vor.u32 %v3189_v40, %v2741_v39  ;;  %v3209_v39 = vld [vmem:[#allocation5 + $0x594] sm:$0xf0]  ;;  %v2677_v40 = vld [vmem:[#allocation5 + $0x468] sm:$0xf] }
  0x87   :  { %1556 = vmatpush.bf16.msra.mxu2 %v2582_v49  ;;  %1528 = vmatpush.bf16.msra.mxu3 %v2326_v53  ;;  %v2885_v49 = vld [vmem:[#allocation5 + $0x608] sm:$0xf]  ;;  %v3065_v53 = vld [vmem:[#allocation5 + $0x114] sm:$0xf0]  ;;  %v2822_v46 = vor.u32 %v3209_v39, %v2821_v38  ;;  %v3119_v38 = vld [vmem:[#allocation5 + $0x2cc] sm:$0xf]  ;;  %v2122_v39 = vor.u32 %v3031_v27, %v2119_v28 }
  0x88   :  { %v2886_v2 = vor.u32 %v3225_v51, %v2885_v49  ;;  %v2246_v5 = vor.u32 %v3065_v53, %v2245_v43  ;;  %v3079_v43 = vld [vmem:[#allocation5 + $0x18c] sm:$0xf]  ;;  %v3205_v53 = vld [vmem:[#allocation5 + $0x574] sm:$0xf0]  ;;  %v2661_v56 = vld [vmem:[#allocation5 + $0x448] sm:$0xf] }
  0x89   :  { %1544 = vmatpush.bf16.msrb.mxu0 %v2422_v11  ;;  %v2314_v51 = vor.u32 %v3079_v43, %v2311_v44  ;;  %v2247_v43 = vld [vmem:[#allocation5 + $0x118] sm:$0xf0] }
  0x8a   :  { %1516 = vmatpush.bf16.msrb.mxu1 %v2166_v7  ;;  %2892 = vmatmul.msk.bf16.vlgmr.msrb.gmra.mxu3 %vm1312_vm0, %v3475_v50  ;;  %v2870_v7 = vor.u32 %v3221_v62, %v2869_v61  ;;  %v2551_v28 = vld [vmem:[#allocation5 + $0x378] sm:$0xf0] }
  0x8b   :  { %1557 = vmatpush.bf16.msra.mxu2 %v2566_v1  ;;  %1529 = vmatpush.bf16.msra.mxu3 %v2310_v4  ;;  %v3185_v1 = vld [vmem:[#allocation5 + $0x4d4] sm:$0xf0]  ;;  %v2359_v4 = vld [vmem:[#allocation5 + $0x1f8] sm:$0xf0] }
  0x8c   :  { %v2726_v11 = vor.u32 %v3185_v1, %v2725_v63  ;;  %v2362_v12 = vor.u32 %v3091_v3, %v2359_v4  ;;  %v3039_v63 = vld [vmem:[#allocation5 + $0x4c] sm:$0xf]  ;;  %v2662_v1 = vor.u32 %v3169_v57, %v2661_v56  ;;  %v2789_v3 = vld [vmem:[#allocation5 + $0x548] sm:$0xf]  ;;  %v3201_v4 = vld [vmem:[#allocation5 + $0x554] sm:$0xf0] }
  0x8d   :  { %1545 = vmatpush.bf16.msrb.mxu0 %v2406_v23  ;;  %v2710_v23 = vor.u32 %v3181_v16, %v2709_v15  ;;  %v2773_v16 = vld [vmem:[#allocation5 + $0x528] sm:$0xf]  ;;  %v3183_v56 = vld [vmem:[#allocation5 + $0x4cc] sm:$0xf]  ;;  %v2727_v57 = vld [vmem:[#allocation5 + $0x4d8] sm:$0xf0] }
  0x8e   :  { %1517 = vmatpush.bf16.msrb.mxu1 %v2150_v20 }
  0x8f   :  { %1558 = vmatpush.bf16.msra.mxu2 %v2550_v14  ;;  %1530 = vmatpush.bf16.msra.mxu3 %v2294_v17  ;;  %v3217_v14 = vld [vmem:[#allocation5 + $0x5d4] sm:$0xf0]  ;;  %v3087_v17 = vld [vmem:[#allocation5 + $0x1cc] sm:$0xf] }
  0x90   :  { %v2854_v20 = vor.u32 %v3217_v14, %v2853_v13  ;;  %v2346_v24 = vor.u32 %v3087_v17, %v2343_v18  ;;  %v2135_v13 = vld [vmem:[#allocation5 + $0x38] sm:$0xf0]  ;;  %v3197_v17 = vld [vmem:[#allocation5 + $0x534] sm:$0xf0]  ;;  %v2629_v18 = vld [vmem:[#allocation5 + $0x408] sm:$0xf] }
  0x91   :  { %1546 = vmatpush.bf16.msrb.mxu0 %v2390_v36 }
  0x92   :  { %1518 = vmatpush.bf16.msrb.mxu1 %v2134_v32 }
  0x93   :  { %1559 = vmatpush.bf16.msra.mxu2 %v2534_v26  ;;  %1531 = vmatpush.bf16.msra.mxu3 %v2278_v29  ;;  %v3213_v26 = vld [vmem:[#allocation5 + $0x5b4] sm:$0xf0]  ;;  %v3083_v29 = vld [vmem:[#allocation5 + $0x1ac] sm:$0xf] }
  0x94   :  { %v2838_v32 = vor.u32 %v3213_v26, %v2837_v25  ;;  %v2330_v36 = vor.u32 %v3083_v29, %v2327_v30  ;;  %v2774_v25 = vor.u32 %v3197_v17, %v2773_v16  ;;  %v2757_v26 = vld [vmem:[#allocation5 + $0x508] sm:$0xf]  ;;  %v2567_v17 = vld [vmem:[#allocation5 + $0x398] sm:$0xf0] }
  0x95   :  { %1547 = vmatpush.bf16.msrb.mxu0 %v2374_v59  ;;  %v2295_v59 = vld [vmem:[#allocation5 + $0x178] sm:$0xf0] }
  0x96   :  { %1519 = vmatpush.bf16.msrb.mxu1 %v2118_v52  ;;  %v2805_v52 = vld [vmem:[#allocation5 + $0x568] sm:$0xf] }
  0x97   :  { %1560 = vmatpush.bf16.msra.mxu2 %v2518_v41  ;;  %1532 = vmatpush.bf16.msra.mxu3 %v2262_v47  ;;  %v3173_v41 = vld [vmem:[#allocation5 + $0x474] sm:$0xf0]  ;;  %v3043_v47 = vld [vmem:[#allocation5 + $0x6c] sm:$0xf]  ;;  %v2806_v62 = vor.u32 %v3205_v53, %v2805_v52  ;;  %v2599_v53 = vld [vmem:[#allocation5 + $0x3d8] sm:$0xf0] }
  0x98   :  { %1548 = vmatmul.bf16.vlgmr.msrb.gmra.mxu0 %v3463_v54  ;;  %v2678_v49 = vor.u32 %v3173_v41, %v2677_v40  ;;  %v2170_v61 = vor.u32 %v3043_v47, %v2167_v48  ;;  %v2471_v40 = vld [vmem:[#allocation5 + $0x2d8] sm:$0xf0]  ;;  %v3063_v41 = vld [vmem:[#allocation5 + $0x10c] sm:$0xf] }
  0x99   :  { %1603 = vmatpush.bf16.msra.mxu0 %v2886_v2  ;;  %1520 = vmatmul.bf16.vlgmr.msrb.gmra.mxu1 %v3465_v55  ;;  %v2250_v52 = vor.u32 %v3063_v41, %v2247_v43  ;;  %v3167_v41 = vld [vmem:[#allocation5 + $0x44c] sm:$0xf]  ;;  %v2663_v43 = vld [vmem:[#allocation5 + $0x458] sm:$0xf0] }
  0x9a   :  { %1568 = vmatpush.bf16.msra.mxu1 %v2742_v58  ;;  %v3075_v58 = vld [vmem:[#allocation5 + $0x16c] sm:$0xf] }
  0x9b   :  { %1561 = vmatpush.bf16.msra.mxu2 %v2502_v0  ;;  %1533 = vmatpush.bf16.msra.mxu3 %v2246_v5  ;;  %v2151_v0 = vld [vmem:[#allocation5 + $0x58] sm:$0xf0]  ;;  %v2298_v2 = vor.u32 %v3075_v58, %v2295_v59  ;;  %v2645_v5 = vld [vmem:[#allocation5 + $0x428] sm:$0xf]  ;;  %v3115_v59 = vld [vmem:[#allocation5 + $0x2ac] sm:$0xf] }
  0x9c   :  { %v2154_v10 = vor.u32 %v3039_v63, %v2151_v0  ;;  %v2855_v63 = vld [vmem:[#allocation5 + $0x5d8] sm:$0xf0] }
  0x9d   :  { %1624 = vmatpush.bf16.msrb.mxu0 %v2362_v12  ;;  %v3035_v12 = vld [vmem:[#allocation5 + $0x2c] sm:$0xf] }
  0x9e   :  { %1569 = vmatpush.bf16.msra.mxu1 %v2726_v11  ;;  %1534 = vmatmul.bf16.vlgmr.msra.gmra.mxu3 %v3471_v8  ;;  %v2790_v11 = vor.u32 %v3201_v4, %v2789_v3  ;;  %v2138_v22 = vor.u32 %v3035_v12, %v2135_v13  ;;  %v2583_v4 = vld [vmem:[#allocation5 + $0x3b8] sm:$0xf0] }
  0x9f   :  { %1610 = vmatpush.bf16.msrb.mxu2 %v2234_v6  ;;  %1582 = vmatpush.bf16.msrb.mxu3 %v2870_v7  ;;  %v3165_v6 = vld [vmem:[#allocation5 + $0x434] sm:$0xf0]  ;;  %v3071_v7 = vld [vmem:[#allocation5 + $0x14c] sm:$0xf]  ;;  %v2839_v12 = vld [vmem:[#allocation5 + $0x5b8] sm:$0xf0] }
  0xa0   :  { %1562 = vmatmul.bf16.vlgmr.msra.gmra.mxu2 %v3467_v60  ;;  %v2646_v14 = vor.u32 %v3165_v6, %v2645_v5  ;;  %v2282_v15 = vor.u32 %v3071_v7, %v2279_v9  ;;  %v3179_v5 = vld [vmem:[#allocation5 + $0x4ac] sm:$0xf]  ;;  %v2711_v6 = vld [vmem:[#allocation5 + $0x4b8] sm:$0xf0] }
  0xa1   :  { %1625 = vmatpush.bf16.msrb.mxu0 %v2346_v24  ;;  %v2487_v24 = vld [vmem:[#allocation5 + $0x2f8] sm:$0xf0]  ;;  %v3111_v9 = vld [vmem:[#allocation5 + $0x28c] sm:$0xf] }
  0xa2   :  { %1570 = vmatpush.bf16.msra.mxu1 %v2710_v23  ;;  %v3123_v23 = vld [vmem:[#allocation5 + $0x2ec] sm:$0xf] }
  0xa3   :  { %1611 = vmatpush.bf16.msrb.mxu2 %v2218_v19  ;;  %1583 = vmatpush.bf16.msrb.mxu3 %v2854_v20  ;;  %v3161_v19 = vld [vmem:[#allocation5 + $0x414] sm:$0xf0]  ;;  %v3067_v20 = vld [vmem:[#allocation5 + $0x12c] sm:$0xf]  ;;  %v2490_v34 = vor.u32 %v3123_v23, %v2487_v24 }
  0xa4   :  { %v2630_v29 = vor.u32 %v3161_v19, %v2629_v18  ;;  %v2266_v30 = vor.u32 %v3067_v20, %v2263_v21  ;;  %v3175_v18 = vld [vmem:[#allocation5 + $0x48c] sm:$0xf]  ;;  %v2695_v19 = vld [vmem:[#allocation5 + $0x498] sm:$0xf0] }
  0xa5   :  { %1626 = vmatpush.bf16.msrb.mxu0 %v2330_v36  ;;  %v2743_v36 = vld [vmem:[#allocation5 + $0x4f8] sm:$0xf0]  ;;  %v3107_v21 = vld [vmem:[#allocation5 + $0x26c] sm:$0xf] }
  0xa6   :  { %1571 = vmatpush.bf16.msra.mxu1 %v2694_v35  ;;  %v3187_v35 = vld [vmem:[#allocation5 + $0x4ec] sm:$0xf] }
  0xa7   :  { %1612 = vmatpush.bf16.msrb.mxu2 %v2202_v31  ;;  %1584 = vmatpush.bf16.msrb.mxu3 %v2838_v32  ;;  %v3193_v31 = vld [vmem:[#allocation5 + $0x514] sm:$0xf0]  ;;  %v3155_v32 = vld [vmem:[#allocation5 + $0x3ec] sm:$0xf]  ;;  %v2746_v48 = vor.u32 %v3187_v35, %v2743_v36 }
  0xa8   :  { %2893 = vmatmul.msk.bf16.vlgmr.msra.gmra.mxu0 %vm1312_vm0, %v3475_v50  ;;  %v2758_v44 = vor.u32 %v3193_v31, %v2757_v26  ;;  %v2618_v47 = vor.u32 %v3155_v32, %v2615_v33  ;;  %v3207_v23 = vld [vmem:[#allocation5 + $0x58c] sm:$0xf] }
  0xa9   :  { %1627 = vmatpush.bf16.msrb.mxu0 %v2314_v51  ;;  %v2474_v51 = vor.u32 %v3119_v38, %v2471_v40  ;;  %v3139_v26 = vld [vmem:[#allocation5 + $0x36c] sm:$0xf]  ;;  %v2535_v40 = vld [vmem:[#allocation5 + $0x358] sm:$0xf0] }
  0xaa   :  { %1572 = vmatpush.bf16.msra.mxu1 %v2678_v49  ;;  %v3151_v49 = vld [vmem:[#allocation5 + $0x3cc] sm:$0xf]  ;;  %v2554_v35 = vor.u32 %v3139_v26, %v2551_v28  ;;  %v3232_v26 = vld [vmem:[#allocation8 + $0x30] sm:$0xff] }
  0xab   :  { %1613 = vmatpush.bf16.msrb.mxu2 %v2186_v45  ;;  %1585 = vmatpush.bf16.msrb.mxu3 %v2822_v46  ;;  %v3219_v45 = vld [vmem:[#allocation5 + $0x5ec] sm:$0xf]  ;;  %v2871_v46 = vld [vmem:[#allocation5 + $0x5f8] sm:$0xf0]  ;;  %v2602_v0 = vor.u32 %v3151_v49, %v2599_v53 }
  0xac   :  { %v2874_v58 = vor.u32 %v3219_v45, %v2871_v46  ;;  %v3103_v32 = vld [vmem:[#allocation5 + $0x24c] sm:$0xf]  ;;  %v2391_v46 = vld [vmem:[#allocation5 + $0x238] sm:$0xf0] }
  0xad   :  { %1628 = vmatpush.bf16.msrb.mxu0 %v2298_v2  ;;  %v3147_v2 = vld [vmem:[#allocation5 + $0x3ac] sm:$0xf] }
  0xae   :  { %1573 = vmatpush.bf16.msra.mxu1 %v2662_v1  ;;  %v2730_v1 = vor.u32 %v3183_v56, %v2727_v57  ;;  %v2586_v13 = vor.u32 %v3147_v2, %v2583_v4  ;;  %v3203_v33 = vld [vmem:[#allocation5 + $0x56c] sm:$0xf]  ;;  %v2519_v57 = vld [vmem:[#allocation5 + $0x338] sm:$0xf0] }
  0xaf   :  { %1614 = vmatpush.bf16.msrb.mxu2 %v2170_v61  ;;  %1586 = vmatpush.bf16.msrb.mxu3 %v2806_v62  ;;  %v2455_v61 = vld [vmem:[#allocation5 + $0x2b8] sm:$0xf0]  ;;  %v3215_v62 = vld [vmem:[#allocation5 + $0x5cc] sm:$0xf] }
  0xb0   :  { %v2458_v3 = vor.u32 %v3115_v59, %v2455_v61  ;;  %v2858_v7 = vor.u32 %v3215_v62, %v2855_v63  ;;  %v3135_v38 = vld [vmem:[#allocation5 + $0x34c] sm:$0xf]  ;;  %v2647_v59 = vld [vmem:[#allocation5 + $0x438] sm:$0xf0] }
  0xb1   :  { %1629 = vmatpush.bf16.msrb.mxu0 %v2282_v15  ;;  %v3143_v15 = vld [vmem:[#allocation5 + $0x38c] sm:$0xf]  ;;  %v2538_v49 = vor.u32 %v3135_v38, %v2535_v40  ;;  %v2775_v2 = vld [vmem:[#allocation5 + $0x538] sm:$0xf0] }
  0xb2   :  { %1574 = vmatpush.bf16.msra.mxu1 %v2646_v14  ;;  %v2714_v14 = vor.u32 %v3179_v5, %v2711_v6  ;;  %v2570_v24 = vor.u32 %v3143_v15, %v2567_v17  ;;  %v3099_v45 = vld [vmem:[#allocation5 + $0x22c] sm:$0xf]  ;;  %v2887_v4 = vld [vmem:[#allocation5 + $0x618] sm:$0xf0] }
  0xb3   :  { %1615 = vmatpush.bf16.msrb.mxu2 %v2154_v10  ;;  %1587 = vmatpush.bf16.msrb.mxu3 %v2790_v11  ;;  %v2439_v10 = vld [vmem:[#allocation5 + $0x298] sm:$0xf0]  ;;  %v3211_v11 = vld [vmem:[#allocation5 + $0x5ac] sm:$0xf]  ;;  %v2394_v56 = vor.u32 %v3099_v45, %v2391_v46  ;;  %v3228_v46 = vld [vmem:[#allocation8 + $0x10] sm:$0xff] }
  0xb4   :  { %v2442_v16 = vor.u32 %v3111_v9, %v2439_v10  ;;  %v2842_v20 = vor.u32 %v3211_v11, %v2839_v12  ;;  %v1325_v53 = vpop.f32.mrf.mxu0  ;;  %v3095_v63 = vld [vmem:[#allocation5 + $0x20c] sm:$0xf]  ;;  %v2503_v11 = vld [vmem:[#allocation5 + $0x318] sm:$0xf0] }
  0xb5   :  { %1630 = vmatpush.bf16.msrb.mxu0 %v2266_v30  ;;  %v2679_v30 = vld [vmem:[#allocation5 + $0x478] sm:$0xf0]  ;;  %v1339_v61 = vpop.f32.mrf.mxu1  ;;  %v3127_v10 = vld [vmem:[#allocation5 + $0x30c] sm:$0xf] }
  0xb6   :  { %1575 = vmatpush.bf16.msra.mxu1 %v2630_v29  ;;  %v3171_v29 = vld [vmem:[#allocation5 + $0x46c] sm:$0xf]  ;;  %v3229_v40 = vld [vmem:[#allocation8 + $0x18] sm:$0xff] }
  0xb7   :  { %1616 = vmatpush.bf16.msrb.mxu2 %v2138_v22  ;;  %1588 = vmatpush.bf16.msrb.mxu3 %v2774_v25  ;;  %v2423_v22 = vld [vmem:[#allocation5 + $0x278] sm:$0xf0]  ;;  %v2698_v25 = vor.u32 %v3175_v18, %v2695_v19  ;;  %v2682_v36 = vor.u32 %v3171_v29, %v2679_v30  ;;  %v3191_v17 = vld [vmem:[#allocation5 + $0x50c] sm:$0xf]  ;;  %v2506_v19 = vor.u32 %v3127_v10, %v2503_v11 }
  0xb8   :  { %v2426_v27 = vor.u32 %v3107_v21, %v2423_v22  ;;  %v2759_v18 = vld [vmem:[#allocation5 + $0x518] sm:$0xf0]  ;;  %v3231_v30 = vld [vmem:[#allocation8 + $0x28] sm:$0xff] }
  0xb9   :  { %1576 = vmatmul.bf16.vlgmr.msra.gmra.mxu1 %v3479_v37  ;;  %1631 = vmatpush.bf16.msrb.mxu0 %v2250_v52  ;;  %v3131_v52 = vld [vmem:[#allocation5 + $0x32c] sm:$0xf]  ;;  %v3233_v21 = vld [vmem:[#allocation8 + $0x38] sm:$0xff] }
  0xba   :  { %1638 = vmatpush.bf16.msrb.mxu1 %v2490_v34  ;;  %v2807_v34 = vld [vmem:[#allocation5 + $0x578] sm:$0xf0]  ;;  %v2522_v5 = vor.u32 %v3131_v52, %v2519_v57  ;;  %v3227_v52 = vld [vmem:[#allocation8 + $0x8] sm:$0xff] }
  0xbb   :  { %1617 = vmatpush.bf16.msrb.mxu2 %v2122_v39  ;;  %1589 = vmatpush.bf16.msrb.mxu3 %v2758_v44  ;;  %v2810_v44 = vor.u32 %v3203_v33, %v2807_v34  ;;  %v3230_v33 = vld [vmem:[#allocation8 + $0x20] sm:$0xff] }
  0xbc   :  { %1632 = vmatmul.bf16.vlgmr.msrb.gmra.mxu0 %v3471_v8  ;;  %v2407_v8 = vld [vmem:[#allocation5 + $0x258] sm:$0xf0] }
  0xbd   :  { %1680 = vmatpush.bf16.msra.mxu0 %v2874_v58  ;;  %v2410_v39 = vor.u32 %v3103_v32, %v2407_v8  ;;  %v3163_v58 = vld [vmem:[#allocation5 + $0x42c] sm:$0xf] }
  0xbe   :  { %1639 = vmatpush.bf16.msrb.mxu1 %v2474_v51  ;;  %1590 = vmatmul.bf16.vlgmr.msrb.gmra.mxu3 %v3481_v42  ;;  %v2666_v51 = vor.u32 %v3167_v41, %v2663_v43  ;;  %v2650_v6 = vor.u32 %v3163_v58, %v2647_v59  ;;  %v3240_v43 = vld [vmem:[#allocation8 + $0x70] sm:$0xff]  ;;  %v3226_v58 = vld [vmem:[#allocation8] sm:$0xff] }
  0xbf   :  { %1652 = vmatpush.bf16.msra.mxu3 %v2618_v47  ;;  %1666 = vmatpush.bf16.msra.mxu2 %v2746_v48  ;;  %v3199_v47 = vld [vmem:[#allocation5 + $0x54c] sm:$0xf]  ;;  %v2791_v48 = vld [vmem:[#allocation5 + $0x558] sm:$0xf0] }
  0xc0   :  { %1618 = vmatmul.bf16.vlgmr.msrb.gmra.mxu2 %v3465_v55  ;;  %v2823_v55 = vld [vmem:[#allocation5 + $0x598] sm:$0xf0]  ;;  %v2794_v62 = vor.u32 %v3199_v47, %v2791_v48  ;;  %v3239_v48 = vld [vmem:[#allocation8 + $0x68] sm:$0xff] }
  0xc1   :  { %1681 = vmatpush.bf16.msra.mxu0 %v2858_v7  ;;  %v2826_v31 = vor.u32 %v3207_v23, %v2823_v55  ;;  %v1353_v7 = vpop.f32.mrf.mxu2  ;;  %v2762_v23 = vor.u32 %v3191_v17, %v2759_v18  ;;  %v1327_v55 = vpop.f32.mrf.mxu0 }
  0xc2   :  { %1640 = vmatpush.bf16.msrb.mxu1 %v2458_v3  ;;  %v3223_v3 = vld [vmem:[#allocation5 + $0x60c] sm:$0xf] }
  0xc3   :  { %1653 = vmatpush.bf16.msra.mxu3 %v2602_v0  ;;  %1667 = vmatpush.bf16.msra.mxu2 %v2730_v1  ;;  %v2375_v0 = vld [vmem:[#allocation5 + $0x218] sm:$0xf0]  ;;  %v3195_v1 = vld [vmem:[#allocation5 + $0x52c] sm:$0xf]  ;;  %v2890_v15 = vor.u32 %v3223_v3, %v2887_v4  ;;  %v3234_v4 = vld [vmem:[#allocation8 + $0x40] sm:$0xff] }
  0xc4   :  { %v2378_v9 = vor.u32 %v3095_v63, %v2375_v0  ;;  %v2778_v12 = vor.u32 %v3195_v1, %v2775_v2  ;;  %v3236_v0 = vld [vmem:[#allocation8 + $0x50] sm:$0xff]  ;;  %v3235_v1 = vld [vmem:[#allocation8 + $0x48] sm:$0xff] }
  0xc5   :  { %1682 = vmatpush.bf16.msra.mxu0 %v2842_v20 }
  0xc6   :  { %1641 = vmatpush.bf16.msrb.mxu1 %v2442_v16  ;;  %v3503_v16 = vld [vmem:[#allocation7] sm:$0xf] }
  0xc7   :  { %1654 = vmatpush.bf16.msra.mxu3 %v2586_v13  ;;  %1668 = vmatpush.bf16.msra.mxu2 %v2714_v14  ;;  %v3159_v13 = vld [vmem:[#allocation5 + $0x40c] sm:$0xf]  ;;  %v2631_v14 = vld [vmem:[#allocation5 + $0x418] sm:$0xf0]  ;;  %v289_v22 = vperm.slane %v3503_v16, 0 }
  0xc8   :  { %v2634_v20 = vor.u32 %v3159_v13, %v2631_v14 }
  0xc9   :  { %1683 = vmatpush.bf16.msra.mxu0 %v2826_v31  ;;  %v1328_v28 = vadd.f32 %v1327_v55, %v289_v22  ;;  %v1355_v29 = vpop.f32.mrf.mxu2  ;;  %v3248_v55 = vld [vmem:[#allocation8 + $0xb0] sm:$0xff] }
  0xca   :  { %1642 = vmatpush.bf16.msrb.mxu1 %v2426_v27  ;;  %v1326_v27 = vadd.f32 %v1325_v53, %v289_v22 }
  0xcb   :  { %1655 = vmatpush.bf16.msra.mxu3 %v2570_v24  ;;  %1669 = vmatpush.bf16.msra.mxu2 %v2698_v25  ;;  %v1341_v24 = vpop.f32.mrf.mxu1  ;;  %v1367_v25 = vpop.f32.mrf.mxu3 }
  0xcc   :  { %v1340_v31 = vadd.f32 %v1339_v61, %v1326_v27  ;;  %v1342_v32 = vadd.f32 %v1341_v24, %v1328_v28  ;;  %v3237_v61 = vld [vmem:[#allocation8 + $0x58] sm:$0xff] }
  0xcd   :  { %1684 = vmatpush.bf16.msra.mxu0 %v2810_v44 }
  0xce   :  { %1643 = vmatpush.bf16.msrb.mxu1 %v2410_v39  ;;  %v1354_v34 = vadd.f32 %v1353_v7, %v1340_v31  ;;  %v3241_v39 = vld [vmem:[#allocation8 + $0x78] sm:$0xff]  ;;  %v290_v7 = vperm.slane %v3503_v16, 1 }
  0xcf   :  { %1656 = vmatpush.bf16.msra.mxu3 %v2554_v35  ;;  %1670 = vmatpush.bf16.msra.mxu2 %v2682_v36  ;;  %v1356_v35 = vadd.f32 %v1355_v29, %v1342_v32 }
  0xd1   :  { %1685 = vmatpush.bf16.msra.mxu0 %v2794_v62  ;;  %v1409_v38 = vpop.f32.mrf.mxu2 }
  0xd2   :  { %1644 = vmatpush.bf16.msrb.mxu1 %v2394_v56  ;;  %v3238_v56 = vld [vmem:[#allocation8 + $0x60] sm:$0xff] }
  0xd3   :  { %1657 = vmatpush.bf16.msra.mxu3 %v2538_v49  ;;  %1671 = vmatpush.bf16.msra.mxu2 %v2666_v51  ;;  %v1369_v36 = vpop.f32.mrf.mxu3 }
  0xd5   :  { %1686 = vmatpush.bf16.msra.mxu0 %v2778_v12 }
  0xd6   :  { %1645 = vmatpush.bf16.msrb.mxu1 %v2378_v9  ;;  %v1395_v8 = vpop.f32.mrf.mxu1 }
  0xd7   :  { %1658 = vmatpush.bf16.msra.mxu3 %v2522_v5  ;;  %1672 = vmatpush.bf16.msra.mxu2 %v2650_v6 }
  0xd9   :  { %1646 = vmatmul.bf16.vlgmr.msrb.gmra.mxu1 %v3463_v54  ;;  %1687 = vmatpush.bf16.msra.mxu0 %v2762_v23  ;;  %v1381_v54 = vpop.f32.mrf.mxu0  ;;  %v1411_v51 = vpop.f32.mrf.mxu2 }
  0xda   :  { %1701 = vmatpush.bf16.msra.mxu1 %v2890_v15 }
  0xdb   :  { %1659 = vmatpush.bf16.msra.mxu3 %v2506_v19  ;;  %1673 = vmatpush.bf16.msra.mxu2 %v2634_v20 }
  0xdc   :  { %1688 = vmatmul.bf16.vlgmr.msra.gmra.mxu0 %v3481_v42 }
  0xde   :  { %1660 = vmatmul.bf16.vlgmr.msra.gmra.mxu3 %v3467_v60  ;;  %1674 = vmatmul.bf16.vlgmr.msra.gmra.mxu2 %v3479_v37  ;;  %v1368_v60 = vadd.f32 %v1367_v25, %v1354_v34  ;;  %v1370_v37 = vadd.f32 %v1369_v36, %v1356_v35  ;;  %v1397_v45 = vpop.f32.mrf.mxu1 }
  0xdf   :  { %1980 = vmatpush.bf16.msrb.mxu3 %v3233_v21  ;;  %1994 = vmatpush.bf16.msrb.mxu1 %v3241_v39  ;;  %v3249_v21 = vld [vmem:[#allocation8 + $0xb8] sm:$0xff] }
  0xe0   :  { %v1382_v42 = vadd.f32 %v1381_v54, %v1368_v60  ;;  %2008 = vmatpush.bf16.msrb.mxu2 %v3249_v21  ;;  %v3246_v54 = vld [vmem:[#allocation8 + $0xa0] sm:$0xff] }
  0xe1   :  { %v1383_v41 = vpop.f32.mrf.mxu0  ;;  %v1437_v2 = vpop.f32.mrf.mxu2 }
  0xe2   :  { %v1384_v44 = vadd.f32 %v1383_v41, %v1370_v37  ;;  %v1396_v49 = vadd.f32 %v1395_v8, %v1382_v42  ;;  %v3243_v37 = vld [vmem:[#allocation8 + $0x88] sm:$0xff]  ;;  %v3242_v41 = vld [vmem:[#allocation8 + $0x80] sm:$0xff] }
  0xe3   :  { %1981 = vmatpush.bf16.msrb.mxu3 %v3232_v26  ;;  %1995 = vmatpush.bf16.msrb.mxu1 %v3240_v43 }
  0xe4   :  { %v1398_v47 = vadd.f32 %v1397_v45, %v1384_v44  ;;  %v1410_v57 = vadd.f32 %v1409_v38, %v1396_v49  ;;  %2009 = vmatpush.bf16.msrb.mxu2 %v3248_v55  ;;  %v3245_v38 = vld [vmem:[#allocation8 + $0x98] sm:$0xff]  ;;  %v291_v44 = vperm.slane %v3503_v16, 2 }
  0xe6   :  { %v1412_v53 = vadd.f32 %v1411_v51, %v1398_v47  ;;  %v1708_v62 = vmax.f32 %v1410_v57, 0.0 }
  0xe7   :  { %1982 = vmatpush.bf16.msrb.mxu3 %v3231_v30  ;;  %1996 = vmatpush.bf16.msrb.mxu1 %v3239_v48  ;;  %v3247_v30 = vld [vmem:[#allocation8 + $0xa8] sm:$0xff]  ;;  %v3256_v48 = vld [vmem:[#allocation8 + $0xf0] sm:$0xff] }
  0xe8   :  { %v1712_v59 = vmax.f32 %v1412_v53, 0.0  ;;  %2010 = vmatpush.bf16.msrb.mxu2 %v3247_v30 }
  0xe9   :  { %2894 = vmatmul.msk.bf16.vlgmr.msra.gmra.mxu1 %vm1312_vm0, %v3475_v50  ;;  %v1423_v50 = vpop.f32.mrf.mxu3  ;;  %v1439_v9 = vpop.f32.mrf.mxu2 }
  0xea   :  { %v1716_v63 = vpack.c.bf16 %v1712_v59, %v1708_v62  ;;  %v1424_v11 = vadd.f32 %v1423_v50, %v290_v7 }
  0xeb   :  { %1983 = vmatpush.bf16.msrb.mxu3 %v3230_v33  ;;  %1997 = vmatpush.bf16.msrb.mxu1 %v3238_v56 }
  0xec   :  { %v1438_v14 = vadd.f32 %v1437_v2, %v1424_v11  ;;  %2011 = vmatpush.bf16.msrb.mxu2 %v3246_v54 }
  0xef   :  { %1984 = vmatpush.bf16.msrb.mxu3 %v3229_v40  ;;  %1998 = vmatpush.bf16.msrb.mxu1 %v3237_v61  ;;  %v3244_v40 = vld [vmem:[#allocation8 + $0x90] sm:$0xff]  ;;  %v3254_v61 = vld [vmem:[#allocation8 + $0xe0] sm:$0xff] }
  0xf0   :  { %2012 = vmatpush.bf16.msrb.mxu2 %v3245_v38 }
  0xf1   :  { %v1425_v3 = vpop.f32.mrf.mxu3 }
  0xf2   :  { %v1426_v12 = vadd.f32 %v1425_v3, %v290_v7 }
  0xf3   :  { %1985 = vmatpush.bf16.msrb.mxu3 %v3228_v46  ;;  %1999 = vmatpush.bf16.msrb.mxu1 %v3236_v0  ;;  %v3257_v46 = vld [vmem:[#allocation8 + $0xf8] sm:$0xff] }
  0xf4   :  { %v1440_v18 = vadd.f32 %v1439_v9, %v1426_v12  ;;  %2013 = vmatpush.bf16.msrb.mxu2 %v3244_v40  ;;  %2022 = vmatpush.bf16.msrb.mxu0 %v3257_v46 }
  0xf5   :  { %v1451_v5 = vpop.f32.mrf.mxu0 }
  0xf6   :  { %v1465_v10 = vpop.f32.mrf.mxu1  ;;  %v1452_v19 = vadd.f32 %v1451_v5, %v1438_v14 }
  0xf7   :  { %1986 = vmatpush.bf16.msrb.mxu3 %v3227_v52  ;;  %2000 = vmatpush.bf16.msrb.mxu1 %v3235_v1 }
  0xf8   :  { %v1466_v23 = vadd.f32 %v1465_v10, %v1452_v19  ;;  %2014 = vmatpush.bf16.msrb.mxu2 %v3243_v37  ;;  %2023 = vmatpush.bf16.msrb.mxu0 %v3256_v48  ;;  %v3252_v10 = vld [vmem:[#allocation8 + $0xd0] sm:$0xff] }
  0xfb   :  { %1987 = vmatpush.bf16.msrb.mxu3 %v3226_v58  ;;  %2001 = vmatpush.bf16.msrb.mxu1 %v3234_v4  ;;  %v3255_v58 = vld [vmem:[#allocation8 + $0xe8] sm:$0xff]  ;;  %v3253_v4 = vld [vmem:[#allocation8 + $0xd8] sm:$0xff] }
  0xfc   :  { %2015 = vmatpush.bf16.msrb.mxu2 %v3242_v41  ;;  %2024 = vmatpush.bf16.msrb.mxu0 %v3255_v58 }
  0xfd   :  { %v1479_v6 = vpop.f32.mrf.mxu3  ;;  %v1453_v15 = vpop.f32.mrf.mxu0 }
  0xfe   :  { %1988 = vmatmul.bf16.vlgmr.msrb.gmra.mxu3 %v1716_v63  ;;  %v1454_v20 = vadd.f32 %v1453_v15, %v1440_v18  ;;  %v1467_v22 = vpop.f32.mrf.mxu1  ;;  %v1480_v25 = vadd.f32 %v1479_v6, %v1466_v23  ;;  %v292_v23 = vperm.slane %v3503_v16, 3 }
 0x100   :  { %v1468_v26 = vadd.f32 %v1467_v22, %v1454_v20  ;;  %2025 = vmatpush.bf16.msrb.mxu0 %v3254_v61  ;;  %v3250_v22 = vld [vmem:[#allocation8 + $0xc0] sm:$0xff] }
 0x101   :  { %v1493_v17 = vpop.f32.mrf.mxu2 }
 0x102   :  { %v1494_v29 = vadd.f32 %v1493_v17, %v1480_v25  ;;  %v3251_v17 = vld [vmem:[#allocation8 + $0xc8] sm:$0xff] }
 0x104   :  { %2026 = vmatpush.bf16.msrb.mxu0 %v3253_v4 }
 0x105   :  { %v1481_v13 = vpop.f32.mrf.mxu3 }
 0x106   :  { %v1482_v27 = vadd.f32 %v1481_v13, %v1468_v26 }
 0x108   :  { %2027 = vmatpush.bf16.msrb.mxu0 %v3252_v10 }
 0x109   :  { %v1495_v28 = vpop.f32.mrf.mxu2 }
 0x10a   :  { %v1496_v31 = vadd.f32 %v1495_v28, %v1482_v27 }
 0x10c   :  { %2028 = vmatpush.bf16.msrb.mxu0 %v3251_v17 }
 0x10d   :  { %v1507_v24 = vpop.f32.mrf.mxu3 }
 0x10e   :  { %v1508_v32 = vadd.f32 %v1507_v24, %v1494_v29 }
 0x110   :  { %v1709_v34 = vmax.f32 %v1508_v32, 0.0  ;;  %2029 = vmatpush.bf16.msrb.mxu0 %v3250_v22 }
 0x115   :  { %v1509_v8 = vpop.f32.mrf.mxu3  ;;  %v1549_v39 = vpop.f32.mrf.mxu0 }
 0x116   :  { %v1510_v33 = vadd.f32 %v1509_v8, %v1496_v31  ;;  %v1521_v60 = vpop.f32.mrf.mxu1 }
 0x117   :  { %v1522_v47 = vadd.f32 %v1521_v60, %v291_v44 }
 0x118   :  { %v1713_v35 = vmax.f32 %v1510_v33, 0.0 }
 0x11a   :  { %v1717_v36 = vpack.c.bf16 %v1713_v35, %v1709_v34 }
 0x11c   :  { %2002 = vmatmul.bf16.vlgmr.msrb.gmra.mxu1 %v1717_v36 }
 0x11d   :  { %v1551_v42 = vpop.f32.mrf.mxu0 }
 0x11e   :  { %v1523_v45 = vpop.f32.mrf.mxu1 }
 0x11f   :  { %v1524_v56 = vadd.f32 %v1523_v45, %v291_v44 }
 0x121   :  { %v1535_v43 = vpop.f32.mrf.mxu3 }
 0x122   :  { %v1536_v53 = vadd.f32 %v1535_v43, %v1522_v47 }
 0x123   :  { %v1563_v51 = vpop.f32.mrf.mxu2 }
 0x124   :  { %v1550_v59 = vadd.f32 %v1549_v39, %v1536_v53 }
 0x125   :  { %v1605_v49 = vpop.f32.mrf.mxu0 }
 0x126   :  { %v1564_v63 = vadd.f32 %v1563_v51, %v1550_v59 }
 0x129   :  { %v1537_v52 = vpop.f32.mrf.mxu3 }
 0x12a   :  { %v1538_v50 = vadd.f32 %v1537_v52, %v1524_v56 }
 0x12b   :  { %v1565_v2 = vpop.f32.mrf.mxu2 }
 0x12c   :  { %v1552_v0 = vadd.f32 %v1551_v42, %v1538_v50 }
 0x12d   :  { %v1607_v1 = vpop.f32.mrf.mxu0 }
 0x12e   :  { %v1566_v6 = vadd.f32 %v1565_v2, %v1552_v0 }
 0x136   :  { %v1577_v57 = vpop.f32.mrf.mxu1 }
 0x137   :  { %v1578_v3 = vadd.f32 %v1577_v57, %v1564_v63 }
 0x139   :  { %v1633_v15 = vpop.f32.mrf.mxu0 }
 0x13e   :  { %v1579_v5 = vpop.f32.mrf.mxu1 }
 0x13f   :  { %v1580_v9 = vadd.f32 %v1579_v5, %v1566_v6 }
 0x141   :  { %v1591_v62 = vpop.f32.mrf.mxu3  ;;  %v1635_v25 = vpop.f32.mrf.mxu0 }
 0x142   :  { %v1592_v7 = vadd.f32 %v1591_v62, %v1578_v3 }
 0x143   :  { %v1619_v18 = vpop.f32.mrf.mxu2 }
 0x144   :  { %v1606_v12 = vadd.f32 %v1605_v49, %v1592_v7  ;;  %v1620_v24 = vadd.f32 %v1619_v18, %v292_v23  ;;  %v3271_v49 = vld [vmem:[%s3525_s4] ss:$0 sm:$0xff]  ;;  %s3418_s4 = smov [#allocation10]  }
 0x145   :  { %s2062_s17 = sshll.u32 %s3418_s4, 4  ;;  %s2063_s17 = int_to_ptr.vmem [resolvable:$true] %s2062_s17 }
 0x146   :  { %v1710_v19 = vmax.f32 %v1606_v12, 0.0  ;;  %v1634_v27 = vadd.f32 %v1633_v15, %v1620_v24 }
 0x149   :  { %v1593_v11 = vpop.f32.mrf.mxu3 }
 0x14a   :  { %v1594_v13 = vadd.f32 %v1593_v11, %v1580_v9 }
 0x14b   :  { %v1621_v26 = vpop.f32.mrf.mxu2 }
 0x14c   :  { %v1608_v14 = vadd.f32 %v1607_v1, %v1594_v13  ;;  %v1622_v31 = vadd.f32 %v1621_v26, %v292_v23 }
 0x14e   :  { %v1714_v20 = vmax.f32 %v1608_v14, 0.0  ;;  %v1636_v33 = vadd.f32 %v1635_v25, %v1622_v31 }
 0x150   :  { %v1718_v21 = vpack.c.bf16 %v1714_v20, %v1710_v19 }
 0x152   :  { %2016 = vmatmul.bf16.vlgmr.msrb.gmra.mxu2 %v1718_v21 }
 0x156   :  { %v1647_v55 = vpop.f32.mrf.mxu1 }
 0x157   :  { %v1648_v29 = vadd.f32 %v1647_v55, %v1634_v27 }
 0x159   :  { %v1689_v54 = vpop.f32.mrf.mxu0 }
 0x15e   :  { %v1649_v28 = vpop.f32.mrf.mxu1 }
 0x15f   :  { %v1650_v35 = vadd.f32 %v1649_v28, %v1636_v33 }
 0x161   :  { %v1661_v30 = vpop.f32.mrf.mxu3  ;;  %v1675_v32 = vpop.f32.mrf.mxu2 }
 0x162   :  { %v1662_v8 = vadd.f32 %v1661_v30, %v1648_v29  ;;  %v1691_v37 = vpop.f32.mrf.mxu0 }
 0x164   :  { %v1676_v34 = vadd.f32 %v1675_v32, %v1662_v8 }
 0x166   :  { %v1703_v36 = vpop.f32.mrf.mxu1  ;;  %v1690_v39 = vadd.f32 %v1689_v54, %v1676_v34 }
 0x168   :  { %v1704_v43 = vadd.f32 %v1703_v36, %v1690_v39 }
 0x169   :  { %v1663_v38 = vpop.f32.mrf.mxu3  ;;  %v1677_v40 = vpop.f32.mrf.mxu2 }
 0x16a   :  { %v1664_v16 = vadd.f32 %v1663_v38, %v1650_v35  ;;  %v1711_v45 = vmax.f32 %v1704_v43, 0.0 }
 0x16c   :  { %v1678_v60 = vadd.f32 %v1677_v40, %v1664_v16 }
 0x16e   :  { %v1692_v41 = vadd.f32 %v1691_v37, %v1678_v60  ;;  %v1705_v42 = vpop.f32.mrf.mxu1 }
 0x170   :  { %v1706_v44 = vadd.f32 %v1705_v42, %v1692_v41 }
 0x172   :  { %v1715_v46 = vmax.f32 %v1706_v44, 0.0 }
 0x174   :  { %v1719_v47 = vpack.c.bf16 %v1715_v46, %v1711_v45 }
 0x176   :  { %2030 = vmatmul.bf16.vlgmr.msrb.gmra.mxu0 %v1719_v47 }
 0x181   :  { %v1989_v48 = vpop.f32.mrf.mxu3 }
 0x182   :  { %v1990_v53 = vadd.f32 %v3271_v49, %v1989_v48 }
 0x189   :  { %v1991_v58 = vpop.f32.mrf.mxu3 }
 0x18a   :  { %v1992_v62 = vadd.f32 %v3271_v49, %v1991_v58 }
 0x199   :  { %v2003_v51 = vpop.f32.mrf.mxu1 }
 0x19a   :  { %v2004_v56 = vadd.f32 %v2003_v51, %v1990_v53 }
 0x1a1   :  { %v2005_v61 = vpop.f32.mrf.mxu1 }
 0x1a2   :  { %v2006_v0 = vadd.f32 %v2005_v61, %v1992_v62 }
 0x1d5   :  { %v2017_v52 = vpop.f32.mrf.mxu2 }
 0x1d6   :  { %v2018_v57 = vadd.f32 %v2017_v52, %v2004_v56 }
 0x1dd   :  { %v2019_v63 = vpop.f32.mrf.mxu2 }
 0x1de   :  { %v2020_v1 = vadd.f32 %v2019_v63, %v2006_v0 }
 0x1f3   :  { %v2031_v59 = vpop.f32.mrf.mxu0 }
 0x1f4   :  { %v2032_v50 = vadd.f32 %v2031_v59, %v2018_v57 }
 0x1f6   :  { %2036 = vmax.xlane.f32.xlu0 %v2032_v50 }
 0x1fb   :  { %v2033_v2 = vpop.f32.mrf.mxu0 }
 0x1fc   :  { %v2034_v3 = vadd.f32 %v2033_v2, %v2020_v1 }
 0x1fe   :  { %2038 = vmax.xlane.f32.xlu0 %v2034_v3 }
 0x269   :  { %v2037_v4 = vpop.xlane.xlu0 %2036 }
 0x26a   :  { %v2040_v5 = vsub.f32 %v2032_v50, %v2037_v4 }
 0x26c   :  { %v2042_v6 = vmul.f32 1.442695, %v2040_v5 }
 0x26e   :  { %3272 = vpow2.f32 %v2042_v6 }
 0x271   :  { %v2039_v7 = vpop.xlane.xlu0 %2038 }
 0x272   :  { %v2041_v9 = vsub.f32 %v2034_v3, %v2039_v7 }
 0x274   :  { %v3273_v10 = vpop.eup %3272  ;;  %v2044_v11 = vmul.f32 1.442695, %v2041_v9 }
 0x275   :  { %2046 = vadd.xlane.f32.xlu1 %v3273_v10 }
 0x276   :  { %3274 = vpow2.f32 %v2044_v11 }
 0x27c   :  { %v3275_v12 = vpop.eup %3274 }
 0x27d   :  { %2048 = vadd.xlane.f32.xlu1 %v3275_v12 }
 0x2e8   :  { %v2047_v13 = vpop.xlane.xlu1 %2046 }
 0x2e9   :  { %3276 = vlog2.f32 %v2047_v13 }
 0x2ef   :  { %v3277_v14 = vpop.eup %3276 }
 0x2f0   :  { %v2051_v15 = vmul.f32 0.6931472, %v3277_v14  ;;  %v2049_v17 = vpop.xlane.xlu1 %2048 }
 0x2f1   :  { %3278 = vlog2.f32 %v2049_v17 }
 0x2f2   :  { %v2054_v18 = vsub.f32 %v2040_v5, %v2051_v15 }
 0x2f4   :  { %2056 = vst [vmem:[#allocation10] sm:$0xff] %v2054_v18 }
 0x2f7   :  { %v3279_v19 = vpop.eup %3278 }
 0x2f8   :  { %v2053_v20 = vmul.f32 0.6931472, %v3279_v19 }
 0x2fa   :  { %v2055_v21 = vsub.f32 %v2041_v9, %v2053_v20 }
 0x2fc   :  { %2057 = vst [vmem:[#allocation10 + $0x8] sm:$0xff] %v2055_v21 }
 0x2fd   :  { %2070 = dma.vmem_to_hbm [thread:$0]  %s2063_s17, 256, %s2065_s20, [#allocation4], %s3419_s21, %s3419_s21, %s3420_s22  }
 0x2fe   :  { %3406 = dma.done.wait [#allocation4], 256  }
 0x2ff   :  { %3407 = vsyncadd [#allocation4], 4294967040 }
 0x300   :  { %2075 = vsyncpa [#allocation3], 1 }
 0x301   :  { %2076 = vsyncpa [#allocation6], 1 }
 0x302   :  { %2077 = vsyncpa [#allocation9], 1 }
 0x303   :  { %2078 = vsyncpa [#allocation4], 1 }

</bundles_post_ra>
